<compile_context>
chip_gen: v7x
topology: tpu7x:2x2x1
jax: 0.10.0
libtpu: 0.0.40
codegen_flags: <defaults>
</compile_context>

<pallas_src>
import jax
import jax.numpy as jnp
from jax.experimental import pallas as pl
from jax.experimental.pallas import tpu as pltpu

# Model dimensions implied by the PyTorch module (h_dim = 5408 = 32 * 13 * 13
# => encoder input must be 3 x 28 x 28).
IMG_C = 3
IMG_HW = 28
CONV_K = 4
CONV_S = 2
CONV_C = 32
OUT_HW = (IMG_HW - CONV_K) // CONV_S + 1          # 13
N_PATCH = OUT_HW * OUT_HW                         # 169
H_DIM = CONV_C * N_PATCH                          # 5408
Z_DIM = 32
DEC_C = 32
DEC_K = 5
DEC_FLAT = DEC_C * DEC_K * DEC_K                  # 800


def _full_spec(shape):
  nd = len(shape)
  return pl.BlockSpec(shape, lambda i, _nd=nd: (0,) * _nd)


_COMPILER_PARAMS = pltpu.CompilerParams(
    dimension_semantics=("arbitrary",),
)


# ---------------------------------------------------------------------------
# Kernel 1: encoder conv (as im2col matmul) + bias + ReLU
#   patches: (B*169, 48) f32   wc: (48, 32) f32   bc: (1, 32) f32
# ---------------------------------------------------------------------------
def _encoder_kernel(p_ref, w_ref, b_ref, h_ref):
  acc = jnp.dot(p_ref[...], w_ref[...], preferred_element_type=jnp.float32)
  h_ref[...] = jnp.maximum(acc + b_ref[...], 0.0)


def encoder_matmul(patches, wc, bc):
  m = patches.shape[0]
  n = wc.shape[1]
  return pl.pallas_call(
      _encoder_kernel,
      out_shape=jax.ShapeDtypeStruct((m, n), jnp.float32),
      grid=(1,),
      in_specs=[_full_spec(patches.shape), _full_spec(wc.shape), _full_spec(bc.shape)],
      out_specs=_full_spec((m, n)),
      compiler_params=_COMPILER_PARAMS,
  )(patches, wc, bc)


# ---------------------------------------------------------------------------
# Kernel 2: fused bottleneck + decoder
#   h: (B, 5408) f32 (already in (spatial, channel) order matching w12 rows)
#   w12: (5408, 64) bf16  -> [mu | logvar]
#   w_eff: (32, 800) bf16 -> fc3 folded into ConvTranspose2d
# ---------------------------------------------------------------------------
def _bottleneck_decoder_kernel(h_ref, w12_ref, b12_ref, eps_ref, weff_ref, beff_ref,
                               out_ref, mulv_ref):
  h = h_ref[...].astype(jnp.bfloat16)
  mulv = jnp.dot(h, w12_ref[...], preferred_element_type=jnp.float32) + b12_ref[...]
  mu = mulv[:, :Z_DIM]
  lv = mulv[:, Z_DIM:]
  z = mu + eps_ref[...] * jnp.exp(0.5 * lv)                      # reparameterize
  mulv_ref[...] = mulv
  out = jnp.dot(z.astype(jnp.bfloat16), weff_ref[...],
                preferred_element_type=jnp.float32) + beff_ref[...]
  out_ref[...] = jax.nn.sigmoid(out)


def bottleneck_decoder(h, w12, b12, eps, w_eff, b_eff):
  b_sz = h.shape[0]
  return pl.pallas_call(
      _bottleneck_decoder_kernel,
      out_shape=(jax.ShapeDtypeStruct((b_sz, DEC_FLAT), jnp.float32),
                 jax.ShapeDtypeStruct((b_sz, 2 * Z_DIM), jnp.float32)),
      grid=(1,),
      in_specs=[_full_spec(h.shape), _full_spec(w12.shape), _full_spec(b12.shape),
                _full_spec(eps.shape), _full_spec(w_eff.shape), _full_spec(b_eff.shape)],
      out_specs=(_full_spec((b_sz, DEC_FLAT)), _full_spec((b_sz, 2 * Z_DIM))),
      compiler_params=_COMPILER_PARAMS,
  )(h, w12, b12, eps, w_eff, b_eff)


# ---------------------------------------------------------------------------
# Parameter init (PyTorch-layout tensors) and one-time kernel-layout prep
# ---------------------------------------------------------------------------
def init_params(key):
  ks = jax.random.split(key, 10)
  s = 0.05
  return dict(
      conv_w=jax.random.normal(ks[0], (CONV_C, IMG_C, CONV_K, CONV_K), jnp.float32) * s,
      conv_b=jax.random.normal(ks[1], (CONV_C,), jnp.float32) * s,
      fc1_w=jax.random.normal(ks[2], (Z_DIM, H_DIM), jnp.float32) * 0.01,   # (out, in) like torch
      fc1_b=jax.random.normal(ks[3], (Z_DIM,), jnp.float32) * 0.01,
      fc2_w=jax.random.normal(ks[4], (Z_DIM, H_DIM), jnp.float32) * 0.01,
      fc2_b=jax.random.normal(ks[5], (Z_DIM,), jnp.float32) * 0.01,
      fc3_w=jax.random.normal(ks[6], (H_DIM, Z_DIM), jnp.float32) * 0.01,
      fc3_b=jax.random.normal(ks[7], (H_DIM,), jnp.float32) * 0.01,
      deconv_w=jax.random.normal(ks[8], (H_DIM, DEC_C, DEC_K, DEC_K), jnp.float32) * 0.01,
      deconv_b=jax.random.normal(ks[9], (DEC_C,), jnp.float32) * 0.01,
  )


def prepare_params(params):
  """One-time weight prep: transposes, NCHW-order fold into fc1/fc2, fc3->deconv fold, bf16."""
  # Conv2d as an im2col matmul: (48, 32) weight, (1, 32) bias (tiny; keep f32).
  wc = params["conv_w"].reshape(CONV_C, IMG_C * CONV_K * CONV_K).T
  bc = params["conv_b"].reshape(1, CONV_C)

  # fc1/fc2 merged into one (5408, 64) bf16 weight.  Rows permuted from PyTorch's
  # NCHW flatten order (c*169+s) to the encoder's native (s*32+c) order so the kernel
  # consumes h exactly as the conv matmul produces it (no runtime transpose of h).
  def permute_rows(w_t):                      # w_t: (5408, Z_DIM) indexed by c*169+s
    return w_t.reshape(CONV_C, N_PATCH, Z_DIM).transpose(1, 0, 2).reshape(H_DIM, Z_DIM)

  w12 = jnp.concatenate([permute_rows(params["fc1_w"].T),
                         permute_rows(params["fc2_w"].T)], axis=1).astype(jnp.bfloat16)
  b12 = jnp.concatenate([params["fc1_b"], params["fc2_b"]]).reshape(1, 2 * Z_DIM)

  # Fold fc3 into the ConvTranspose2d (valid: no activation between them in the module).
  # ConvTranspose2d on a 1x1 spatial input is exactly h2 @ deconv_w.reshape(5408, 800).
  wd = params["deconv_w"].reshape(H_DIM, DEC_FLAT)
  bd = jnp.repeat(params["deconv_b"], DEC_K * DEC_K)
  w_eff = (params["fc3_w"].T @ wd).astype(jnp.bfloat16)          # (32, 800)
  b_eff = (params["fc3_b"] @ wd + bd).reshape(1, DEC_FLAT)       # (1, 800) f32

  return dict(wc=wc, bc=bc, w12=w12, b12=b12, w_eff=w_eff, b_eff=b_eff)


# ---------------------------------------------------------------------------
# Glue: im2col + forward pass
# ---------------------------------------------------------------------------
def _im2col(x):
  # x: (B, C, 28, 28) NCHW -> patches (B*169, C*4*4), last dim ordered (ci, kh, kw)
  b = x.shape[0]
  cols = []
  for kh in range(CONV_K):
    for kw in range(CONV_K):
      cols.append(x[:, :, kh:kh + CONV_S * OUT_HW:CONV_S,
                        kw:kw + CONV_S * OUT_HW:CONV_S])          # (B, C, 13, 13)
  p = jnp.stack(cols, axis=2)                                      # (B, C, 16, 13, 13)
  p = p.transpose(0, 3, 4, 1, 2)                                   # (B, 13, 13, C, 16)
  return p.reshape(b * N_PATCH, IMG_C * CONV_K * CONV_K)


@jax.jit
def vae_forward(prep, x, eps):
  b = x.shape[0]

  # ----- encoder: Conv2d(3, 32, k=4, s=2) + ReLU -----
  patches = _im2col(x)
  h_conv = encoder_matmul(patches, prep["wc"], prep["bc"])         # (B*169, 32), ReLU'd
  # Row-major merge (b, s, c) -> (b, s*32+c); free bitcast, matches the permuted w12 rows.
  h = h_conv.reshape(b, H_DIM)

  # ----- fused bottleneck + decoder -----
  out_flat, mulv = bottleneck_decoder(h, prep["w12"], prep["b12"], eps,
                                      prep["w_eff"], prep["b_eff"])
  out = out_flat.reshape(b, DEC_C, DEC_K, DEC_K)                   # NCHW, matches torch
  mu = mulv[:, :Z_DIM]
  logvar = mulv[:, Z_DIM:]
  return out, mu, logvar


if __name__ == "__main__":
  key = jax.random.PRNGKey(0)
  pkey, xkey, ekey = jax.random.split(key, 3)

  params = init_params(pkey)
  prep = prepare_params(params)   # one-time weight fold/permute/bf16 cast

  # Input shape dictated by h_dim=5408: (B, 3, 28, 28). Batch = 2.
  x = jax.random.normal(xkey, (2, IMG_C, IMG_HW, IMG_HW), jnp.float32)
  # eps plays the role of torch.randn_like(std) in reparameterize(), generated
  # deterministically host-side and fed to the kernel.
  eps = jax.random.normal(ekey, (2, Z_DIM), jnp.float32)

  out, mu, logvar = vae_forward(prep, x, eps)
  jax.block_until_ready((out, mu, logvar))

  assert out.shape == (2, DEC_C, DEC_K, DEC_K), out.shape
  assert mu.shape == (2, Z_DIM), mu.shape
  assert logvar.shape == (2, Z_DIM), logvar.shape
  assert bool(jnp.all((out >= 0.0) & (out <= 1.0)))
  assert bool(jnp.all(jnp.isfinite(out))) and bool(jnp.all(jnp.isfinite(mu)))

  print("KERNEL_OK")
</pallas_src>

<mosaic_0001>
module attributes {stable_mosaic.version = 11 : i64} {
  func.func @_encoder_kernel(%arg0: i32, %arg1: memref<338x48xf32, #tpu.memory_space<vmem>>, %arg2: memref<48x32xf32, #tpu.memory_space<vmem>>, %arg3: memref<1x32xf32, #tpu.memory_space<vmem>>, %arg4: memref<338x32xf32, #tpu.memory_space<vmem>>) attributes {dimension_semantics = [#tpu.dimension_semantics<arbitrary>], iteration_bounds = array<i64: 1>, scalar_prefetch = 0 : i64, scratch_operands = 0 : i64, tpu.core_type = #tpu.core_type<tc>, window_params = [{pipeline_mode = #tpu.pipeline_mode<synchronous>, transform_indices = @transform_0, window_bounds = array<i64: 338, 48>}, {pipeline_mode = #tpu.pipeline_mode<synchronous>, transform_indices = @transform_1, window_bounds = array<i64: 48, 32>}, {pipeline_mode = #tpu.pipeline_mode<synchronous>, transform_indices = @transform_2, window_bounds = array<i64: 1, 32>}, {pipeline_mode = #tpu.pipeline_mode<synchronous>, transform_indices = @transform_3, window_bounds = array<i64: 338, 32>}]} {
    %c0 = arith.constant 0 : index
    %c0_0 = arith.constant 0 : index
    %0 = vector.load %arg1[%c0, %c0_0] : memref<338x48xf32, #tpu.memory_space<vmem>>, vector<338x48xf32>
    %c0_1 = arith.constant 0 : index
    %c0_2 = arith.constant 0 : index
    %1 = vector.load %arg2[%c0_1, %c0_2] : memref<48x32xf32, #tpu.memory_space<vmem>>, vector<48x32xf32>
    %cst = arith.constant dense<0.000000e+00> : vector<338x32xf32>
    %2 = tpu.matmul %0, %1, %cst {dimension_numbers = #tpu.dot_dimension_numbers<[1], [0], [0], [1], [0, 0, 1, 1], [], []>} : vector<338x48xf32>, vector<48x32xf32>, vector<338x32xf32> -> vector<338x32xf32>
    %c0_3 = arith.constant 0 : index
    %c0_4 = arith.constant 0 : index
    %3 = vector.load %arg3[%c0_3, %c0_4] : memref<1x32xf32, #tpu.memory_space<vmem>>, vector<1x32xf32>
    %4 = vector.broadcast %3 : vector<1x32xf32> to vector<338x32xf32>
    %5 = arith.addf %2, %4 : vector<338x32xf32>
    %cst_5 = arith.constant 0.000000e+00 : f32
    %6 = vector.broadcast %cst_5 : f32 to vector<338x32xf32>
    %7 = arith.maximumf %5, %6 : vector<338x32xf32>
    %c0_6 = arith.constant 0 : index
    %c0_7 = arith.constant 0 : index
    %8 = vector.load %arg4[%c0_6, %c0_7] : memref<338x32xf32, #tpu.memory_space<vmem>>, vector<338x32xf32>
    tpu.vector_store %arg4[%c0_6, %c0_7], %7 {strides = array<i32>} : memref<338x32xf32, #tpu.memory_space<vmem>>, vector<338x32xf32>,
    return
  }
  func.func @transform_0(%arg0: i32) -> (i32, i32) {
    %c0_i32 = arith.constant 0 : i32
    %c0_i32_0 = arith.constant 0 : i32
    %c0_i32_1 = arith.constant 0 : i32
    return %c0_i32, %c0_i32_0 : i32, i32
  }
  func.func @transform_1(%arg0: i32) -> (i32, i32) {
    %c0_i32 = arith.constant 0 : i32
    %c0_i32_0 = arith.constant 0 : i32
    %c0_i32_1 = arith.constant 0 : i32
    return %c0_i32, %c0_i32_0 : i32, i32
  }
  func.func @transform_2(%arg0: i32) -> (i32, i32) {
    %c0_i32 = arith.constant 0 : i32
    %c0_i32_0 = arith.constant 0 : i32
    %c0_i32_1 = arith.constant 0 : i32
    return %c0_i32, %c0_i32_0 : i32, i32
  }
  func.func @transform_3(%arg0: i32) -> (i32, i32) {
    %c0_i32 = arith.constant 0 : i32
    %c0_i32_0 = arith.constant 0 : i32
    %c0_i32_1 = arith.constant 0 : i32
    return %c0_i32, %c0_i32_0 : i32, i32
  }
}

module attributes {stable_mosaic.version = 11 : i64} {
  func.func @_bottleneck_decoder_kernel(%arg0: i32, %arg1: memref<2x5408xf32, #tpu.memory_space<vmem>>, %arg2: memref<5408x64xbf16, #tpu.memory_space<vmem>>, %arg3: memref<1x64xf32, #tpu.memory_space<vmem>>, %arg4: memref<2x32xf32, #tpu.memory_space<vmem>>, %arg5: memref<32x800xbf16, #tpu.memory_space<vmem>>, %arg6: memref<1x800xf32, #tpu.memory_space<vmem>>, %arg7: memref<2x800xf32, #tpu.memory_space<vmem>>, %arg8: memref<2x64xf32, #tpu.memory_space<vmem>>) attributes {dimension_semantics = [#tpu.dimension_semantics<arbitrary>], iteration_bounds = array<i64: 1>, scalar_prefetch = 0 : i64, scratch_operands = 0 : i64, tpu.core_type = #tpu.core_type<tc>, window_params = [{pipeline_mode = #tpu.pipeline_mode<synchronous>, transform_indices = @transform_0, window_bounds = array<i64: 2, 5408>}, {pipeline_mode = #tpu.pipeline_mode<synchronous>, transform_indices = @transform_1, window_bounds = array<i64: 5408, 64>}, {pipeline_mode = #tpu.pipeline_mode<synchronous>, transform_indices = @transform_2, window_bounds = array<i64: 1, 64>}, {pipeline_mode = #tpu.pipeline_mode<synchronous>, transform_indices = @transform_3, window_bounds = array<i64: 2, 32>}, {pipeline_mode = #tpu.pipeline_mode<synchronous>, transform_indices = @transform_4, window_bounds = array<i64: 32, 800>}, {pipeline_mode = #tpu.pipeline_mode<synchronous>, transform_indices = @transform_5, window_bounds = array<i64: 1, 800>}, {pipeline_mode = #tpu.pipeline_mode<synchronous>, transform_indices = @transform_6, window_bounds = array<i64: 2, 800>}, {pipeline_mode = #tpu.pipeline_mode<synchronous>, transform_indices = @transform_7, window_bounds = array<i64: 2, 64>}]} {
    %c0 = arith.constant 0 : index
    %c0_0 = arith.constant 0 : index
    %0 = vector.load %arg1[%c0, %c0_0] : memref<2x5408xf32, #tpu.memory_space<vmem>>, vector<2x5408xf32>
    %1 = arith.truncf %0 : vector<2x5408xf32> to vector<2x5408xbf16>
    %c0_1 = arith.constant 0 : index
    %c0_2 = arith.constant 0 : index
    %2 = vector.load %arg2[%c0_1, %c0_2] : memref<5408x64xbf16, #tpu.memory_space<vmem>>, vector<5408x64xbf16>
    %cst = arith.constant dense<0.000000e+00> : vector<2x64xf32>
    %3 = tpu.matmul %1, %2, %cst {dimension_numbers = #tpu.dot_dimension_numbers<[1], [0], [0], [1], [0, 0, 1, 1], [], []>} : vector<2x5408xbf16>, vector<5408x64xbf16>, vector<2x64xf32> -> vector<2x64xf32>
    %c0_3 = arith.constant 0 : index
    %c0_4 = arith.constant 0 : index
    %4 = vector.load %arg3[%c0_3, %c0_4] : memref<1x64xf32, #tpu.memory_space<vmem>>, vector<1x64xf32>
    %5 = vector.broadcast %4 : vector<1x64xf32> to vector<2x64xf32>
    %6 = arith.addf %3, %5 : vector<2x64xf32>
    %7 = vector.extract_strided_slice %6 {offsets = [0, 0], sizes = [2, 32], strides = [1, 1]} : vector<2x64xf32> to vector<2x32xf32>
    %8 = vector.extract_strided_slice %6 {offsets = [0, 32], sizes = [2, 32], strides = [1, 1]} : vector<2x64xf32> to vector<2x32xf32>
    %c0_5 = arith.constant 0 : index
    %c0_6 = arith.constant 0 : index
    %9 = vector.load %arg4[%c0_5, %c0_6] : memref<2x32xf32, #tpu.memory_space<vmem>>, vector<2x32xf32>
    %cst_7 = arith.constant 5.000000e-01 : f32
    %10 = vector.broadcast %cst_7 : f32 to vector<2x32xf32>
    %11 = arith.mulf %10, %8 : vector<2x32xf32>
    %12 = math.exp %11 : vector<2x32xf32>
    %13 = arith.mulf %9, %12 : vector<2x32xf32>
    %14 = arith.addf %7, %13 : vector<2x32xf32>
    %c0_8 = arith.constant 0 : index
    %c0_9 = arith.constant 0 : index
    %15 = vector.load %arg8[%c0_8, %c0_9] : memref<2x64xf32, #tpu.memory_space<vmem>>, vector<2x64xf32>
    tpu.vector_store %arg8[%c0_8, %c0_9], %6 {strides = array<i32>} : memref<2x64xf32, #tpu.memory_space<vmem>>, vector<2x64xf32>,
    %16 = arith.truncf %14 : vector<2x32xf32> to vector<2x32xbf16>
    %c0_10 = arith.constant 0 : index
    %c0_11 = arith.constant 0 : index
    %17 = vector.load %arg5[%c0_10, %c0_11] : memref<32x800xbf16, #tpu.memory_space<vmem>>, vector<32x800xbf16>
    %cst_12 = arith.constant dense<0.000000e+00> : vector<2x800xf32>
    %18 = tpu.matmul %16, %17, %cst_12 {dimension_numbers = #tpu.dot_dimension_numbers<[1], [0], [0], [1], [0, 0, 1, 1], [], []>} : vector<2x32xbf16>, vector<32x800xbf16>, vector<2x800xf32> -> vector<2x800xf32>
    %c0_13 = arith.constant 0 : index
    %c0_14 = arith.constant 0 : index
    %19 = vector.load %arg6[%c0_13, %c0_14] : memref<1x800xf32, #tpu.memory_space<vmem>>, vector<1x800xf32>
    %20 = vector.broadcast %19 : vector<1x800xf32> to vector<2x800xf32>
    %21 = arith.addf %18, %20 : vector<2x800xf32>
    %22 = arith.negf %21 : vector<2x800xf32>
    %23 = math.exp %22 : vector<2x800xf32>
    %cst_15 = arith.constant 1.000000e+00 : f32
    %24 = vector.broadcast %cst_15 : f32 to vector<2x800xf32>
    %25 = arith.addf %24, %23 : vector<2x800xf32>
    %26 = arith.divf %24, %25 : vector<2x800xf32>
    %c0_16 = arith.constant 0 : index
    %c0_17 = arith.constant 0 : index
    %27 = vector.load %arg7[%c0_16, %c0_17] : memref<2x800xf32, #tpu.memory_space<vmem>>, vector<2x800xf32>
    tpu.vector_store %arg7[%c0_16, %c0_17], %26 {strides = array<i32>} : memref<2x800xf32, #tpu.memory_space<vmem>>, vector<2x800xf32>,
    return
  }
  func.func @transform_0(%arg0: i32) -> (i32, i32) {
    %c0_i32 = arith.constant 0 : i32
    %c0_i32_0 = arith.constant 0 : i32
    %c0_i32_1 = arith.constant 0 : i32
    return %c0_i32, %c0_i32_0 : i32, i32
  }
  func.func @transform_1(%arg0: i32) -> (i32, i32) {
    %c0_i32 = arith.constant 0 : i32
    %c0_i32_0 = arith.constant 0 : i32
    %c0_i32_1 = arith.constant 0 : i32
    return %c0_i32, %c0_i32_0 : i32, i32
  }
  func.func @transform_2(%arg0: i32) -> (i32, i32) {
    %c0_i32 = arith.constant 0 : i32
    %c0_i32_0 = arith.constant 0 : i32
    %c0_i32_1 = arith.constant 0 : i32
    return %c0_i32, %c0_i32_0 : i32, i32
  }
  func.func @transform_3(%arg0: i32) -> (i32, i32) {
    %c0_i32 = arith.constant 0 : i32
    %c0_i32_0 = arith.constant 0 : i32
    %c0_i32_1 = arith.constant 0 : i32
    return %c0_i32, %c0_i32_0 : i32, i32
  }
  func.func @transform_4(%arg0: i32) -> (i32, i32) {
    %c0_i32 = arith.constant 0 : i32
    %c0_i32_0 = arith.constant 0 : i32
    %c0_i32_1 = arith.constant 0 : i32
    return %c0_i32, %c0_i32_0 : i32, i32
  }
  func.func @transform_5(%arg0: i32) -> (i32, i32) {
    %c0_i32 = arith.constant 0 : i32
    %c0_i32_0 = arith.constant 0 : i32
    %c0_i32_1 = arith.constant 0 : i32
    return %c0_i32, %c0_i32_0 : i32, i32
  }
  func.func @transform_6(%arg0: i32) -> (i32, i32) {
    %c0_i32 = arith.constant 0 : i32
    %c0_i32_0 = arith.constant 0 : i32
    %c0_i32_1 = arith.constant 0 : i32
    return %c0_i32, %c0_i32_0 : i32, i32
  }
  func.func @transform_7(%arg0: i32) -> (i32, i32) {
    %c0_i32 = arith.constant 0 : i32
    %c0_i32_0 = arith.constant 0 : i32
    %c0_i32_1 = arith.constant 0 : i32
    return %c0_i32, %c0_i32_0 : i32, i32
  }
}

</mosaic_0001>

<bundles_post_ra>
// kernel: vae_forward.2
= control target key start
LH: loop header
LB: loop body
LE: loop exit
PB: predicated region body
PF: predicated region fallthrough
CT: control target
= control target key end

     0   :  { %v824_v0 = vmov 0.0|0.0   ;;  %vm825_vm0 = vmmov 0   ;;  %v826_v6 = vmov 0.0   ;;  %vm70_vm1 = vcmask 392192   ;;  %s1342_s1 = inlined_call_operand.vmem [shape: f32[48,32], index: 1, kind: input, shape index: {}]   ;;  %s1343_s0 = inlined_call_operand.vmem [shape: f32[338,48], index: 0, kind: input, shape index: {}]   ;;  %s1344_s2 = inlined_call_operand.vmem [shape: f32[1,32], index: 2, kind: input, shape index: {}]   ;;  %s1345_s3 = inlined_call_operand.vmem [shape: f32[338,32], index: 3, kind: output, shape index: {}]  }
   0x1   :  { %806 = vmatprep.subr.bf16.mxu0 %v824_v0  ;;  %v57_v1 = vld [vmem:[%s1342_s1] sm:$0xff]  ;;  %v58_v2 = vld [vmem:[%s1342_s1 + $0x8] sm:$0xff]  ;;  %815 = vmatprep.subr.bf16.mxu1 %v824_v0  ;;  %v59_v3 = vld [vmem:[%s1342_s1 + $0x10] sm:$0xff]  ;;  %vm523_vm2 = vcmask 261120   ;;  %vm566_vm3 = vcmask 254976  }
   0x2   :  { %v807_v4 = vpack.c.bf16 %v58_v2, %v57_v1  ;;  %v60_v5 = vld [vmem:[%s1342_s1 + $0x18] sm:$0xff]  ;;  %677 = vmatprep.mubr.msk.f32.mxu0 %vm825_vm0, %v826_v6  ;;  %743 = vmatprep.mubr.msk.f32.mxu1 %vm825_vm0, %v826_v6  ;;  %v61_v8 = vld [vmem:[%s1342_s1 + $0x20] sm:$0xff]  ;;  %v62_v9 = vld [vmem:[%s1342_s1 + $0x28] sm:$0xff] }
   0x3   :  { %v810_v7 = vpack.c.bf16 %v60_v5, %v59_v3  ;;  %v813_v10 = vpack.c.bf16 %v62_v9, %v61_v8  ;;  %v14_v11 = vld [vmem:[%s1343_s0] sm:$0xff]  ;;  %v36_v12 = vld [vmem:[%s1343_s0 + $0xb0] sm:$0xff]  ;;  %v15_v13 = vld [vmem:[%s1343_s0 + $0x8] sm:$0xff] }
   0x4   :  { %808 = vmatpush3.bf16.msra.mxu0 %v807_v4  ;;  %818 = vmatpush3.bf16.msra.mxu1 %v807_v4  ;;  %v37_v14 = vld [vmem:[%s1343_s0 + $0xb8] sm:$0xff]  ;;  %v16_v15 = vld [vmem:[%s1343_s0 + $0x10] sm:$0xff]  ;;  %v38_v16 = vld [vmem:[%s1343_s0 + $0xc0] sm:$0xff] }
   0x5   :  { %809 = vmatprep.subr.bf16.mxu0 %v824_v0  ;;  %816 = vmatprep.subr.bf16.mxu1 %v824_v0  ;;  %v17_v17 = vld [vmem:[%s1343_s0 + $0x18] sm:$0xff]  ;;  %v39_v18 = vld [vmem:[%s1343_s0 + $0xc8] sm:$0xff]  ;;  %v18_v19 = vld [vmem:[%s1343_s0 + $0x20] sm:$0xff] }
   0x6   :  { %v40_v20 = vld [vmem:[%s1343_s0 + $0xd0] sm:$0xff]  ;;  %v19_v21 = vld [vmem:[%s1343_s0 + $0x28] sm:$0xff]  ;;  %v41_v22 = vld [vmem:[%s1343_s0 + $0xd8] sm:$0xff] }
   0x7   :  { %v20_v23 = vld [vmem:[%s1343_s0 + $0x30] sm:$0xff]  ;;  %v42_v24 = vld [vmem:[%s1343_s0 + $0xe0] sm:$0xff]  ;;  %v21_v25 = vld [vmem:[%s1343_s0 + $0x38] sm:$0xff] }
   0x8   :  { %811 = vmatpush3.bf16.msra.mxu0 %v810_v7  ;;  %819 = vmatpush3.bf16.msra.mxu1 %v810_v7  ;;  %v43_v26 = vld [vmem:[%s1343_s0 + $0xe8] sm:$0xff]  ;;  %v22_v27 = vld [vmem:[%s1343_s0 + $0x40] sm:$0xff]  ;;  %v44_v28 = vld [vmem:[%s1343_s0 + $0xf0] sm:$0xff] }
   0x9   :  { %812 = vmatprep.subr.bf16.mxu0 %v824_v0  ;;  %817 = vmatprep.subr.bf16.mxu1 %v824_v0  ;;  %v23_v29 = vld [vmem:[%s1343_s0 + $0x48] sm:$0xff]  ;;  %v45_v30 = vld [vmem:[%s1343_s0 + $0xf8] sm:$0xff]  ;;  %v24_v31 = vld [vmem:[%s1343_s0 + $0x50] sm:$0xff] }
   0xa   :  { %v46_v32 = vld [vmem:[%s1343_s0 + $0x100] sm:$0xff]  ;;  %v25_v33 = vld [vmem:[%s1343_s0 + $0x58] sm:$0xff]  ;;  %v47_v34 = vld [vmem:[%s1343_s0 + $0x108] sm:$0xff] }
   0xb   :  { %v26_v35 = vld [vmem:[%s1343_s0 + $0x60] sm:$0xff]  ;;  %v48_v36 = vld [vmem:[%s1343_s0 + $0x110] sm:$0xff]  ;;  %v27_v37 = vld [vmem:[%s1343_s0 + $0x68] sm:$0xff] }
   0xc   :  { %814 = vmatpush3.bf16.msra.mxu0 %v813_v10  ;;  %820 = vmatpush3.bf16.msra.mxu1 %v813_v10  ;;  %v49_v38 = vld [vmem:[%s1343_s0 + $0x118] sm:$0xff]  ;;  %v28_v39 = vld [vmem:[%s1343_s0 + $0x70] sm:$0xff]  ;;  %v50_v40 = vld [vmem:[%s1343_s0 + $0x120] sm:$0xff] }
   0xd   :  { %v29_v41 = vld [vmem:[%s1343_s0 + $0x78] sm:$0xff]  ;;  %v51_v42 = vld [vmem:[%s1343_s0 + $0x128] sm:$0xff]  ;;  %v30_v43 = vld [vmem:[%s1343_s0 + $0x80] sm:$0xff] }
   0xe   :  { %v52_v44 = vld [vmem:[%s1343_s0 + $0x130] sm:$0xff]  ;;  %v31_v45 = vld [vmem:[%s1343_s0 + $0x88] sm:$0xff]  ;;  %v53_v46 = vld [vmem:[%s1343_s0 + $0x138] sm:$0xff] }
   0xf   :  { %678 = vmatmul.mubr.msk.f32.vlgmr.msra.gmra.mrb[0].mxu0 %vm70_vm1, %v14_v11  ;;  %744 = vmatmul.mubr.msk.f32.vlgmr.msra.gmra.mrb[0].mxu1 %vm70_vm1, %v36_v12  ;;  %v32_v47 = vld [vmem:[%s1343_s0 + $0x90] sm:$0xff]  ;;  %v54_v48 = vld [vmem:[%s1343_s0 + $0x140] sm:$0xff]  ;;  %v33_v49 = vld [vmem:[%s1343_s0 + $0x98] sm:$0xff] }
  0x10   :  { %680 = vmatprep.mubr.msk.f32.mxu0 %vm825_vm0, %v826_v6  ;;  %746 = vmatprep.mubr.msk.f32.mxu1 %vm825_vm0, %v826_v6  ;;  %v55_v50 = vld [vmem:[%s1343_s0 + $0x148] sm:$0xff]  ;;  %v34_v51 = vld [vmem:[%s1343_s0 + $0xa0] sm:$0xff]  ;;  %v56_v52 = vld [vmem:[%s1343_s0 + $0x150] sm:$0x3] }
  0x11   :  { %v35_v53 = vld [vmem:[%s1343_s0 + $0xa8] sm:$0xff]  ;;  %v1126_v54 = vld [vmem:[%s1344_s2] ss:$0 sm:$0xff] }
  0x13   :  { %681 = vmatmul.mubr.msk.f32.gmra.mrb[2].mxu0 %vm70_vm1, %v15_v13  ;;  %747 = vmatmul.mubr.msk.f32.gmra.mrb[2].mxu1 %vm70_vm1, %v37_v14 }
  0x14   :  { %683 = vmatprep.mubr.msk.f32.mxu0 %vm825_vm0, %v826_v6  ;;  %749 = vmatprep.mubr.msk.f32.mxu1 %vm825_vm0, %v826_v6 }
  0x17   :  { %684 = vmatmul.mubr.msk.f32.gmra.mrb[4].mxu0 %vm70_vm1, %v16_v15  ;;  %750 = vmatmul.mubr.msk.f32.gmra.mrb[4].mxu1 %vm70_vm1, %v38_v16 }
  0x18   :  { %686 = vmatprep.mubr.msk.f32.mxu0 %vm825_vm0, %v826_v6  ;;  %752 = vmatprep.mubr.msk.f32.mxu1 %vm825_vm0, %v826_v6 }
  0x1b   :  { %687 = vmatmul.mubr.msk.f32.gmra.mrb[6].mxu0 %vm70_vm1, %v17_v17  ;;  %753 = vmatmul.mubr.msk.f32.gmra.mrb[6].mxu1 %vm70_vm1, %v39_v18 }
  0x1c   :  { %689 = vmatprep.mubr.msk.f32.mxu0 %vm825_vm0, %v826_v6  ;;  %755 = vmatprep.mubr.msk.f32.mxu1 %vm825_vm0, %v826_v6 }
  0x1f   :  { %690 = vmatmul.mubr.msk.f32.gmra.mrb[8].mxu0 %vm70_vm1, %v18_v19  ;;  %756 = vmatmul.mubr.msk.f32.gmra.mrb[8].mxu1 %vm70_vm1, %v40_v20 }
  0x20   :  { %692 = vmatprep.mubr.msk.f32.mxu0 %vm825_vm0, %v826_v6  ;;  %758 = vmatprep.mubr.msk.f32.mxu1 %vm825_vm0, %v826_v6 }
  0x23   :  { %693 = vmatmul.mubr.msk.f32.gmra.mrb[10].mxu0 %vm70_vm1, %v19_v21  ;;  %759 = vmatmul.mubr.msk.f32.gmra.mrb[10].mxu1 %vm70_vm1, %v41_v22 }
  0x24   :  { %695 = vmatprep.mubr.msk.f32.mxu0 %vm825_vm0, %v826_v6  ;;  %761 = vmatprep.mubr.msk.f32.mxu1 %vm825_vm0, %v826_v6 }
  0x27   :  { %696 = vmatmul.mubr.msk.f32.gmra.mrb[12].mxu0 %vm70_vm1, %v20_v23  ;;  %762 = vmatmul.mubr.msk.f32.gmra.mrb[12].mxu1 %vm70_vm1, %v42_v24 }
  0x28   :  { %698 = vmatprep.mubr.msk.f32.mxu0 %vm825_vm0, %v826_v6  ;;  %764 = vmatprep.mubr.msk.f32.mxu1 %vm825_vm0, %v826_v6 }
  0x2b   :  { %699 = vmatmul.mubr.msk.f32.gmra.mrb[14].mxu0 %vm70_vm1, %v21_v25  ;;  %765 = vmatmul.mubr.msk.f32.gmra.mrb[14].mxu1 %vm70_vm1, %v43_v26 }
  0x2c   :  { %701 = vmatprep.mubr.msk.f32.mxu0 %vm825_vm0, %v826_v6  ;;  %767 = vmatprep.mubr.msk.f32.mxu1 %vm825_vm0, %v826_v6 }
  0x2f   :  { %702 = vmatmul.mubr.msk.f32.gmra.mrb[16].mxu0 %vm70_vm1, %v22_v27  ;;  %768 = vmatmul.mubr.msk.f32.gmra.mrb[16].mxu1 %vm70_vm1, %v44_v28 }
  0x30   :  { %704 = vmatprep.mubr.msk.f32.mxu0 %vm825_vm0, %v826_v6  ;;  %770 = vmatprep.mubr.msk.f32.mxu1 %vm825_vm0, %v826_v6 }
  0x33   :  { %705 = vmatmul.mubr.msk.f32.gmra.mrb[18].mxu0 %vm70_vm1, %v23_v29  ;;  %771 = vmatmul.mubr.msk.f32.gmra.mrb[18].mxu1 %vm70_vm1, %v45_v30 }
  0x34   :  { %707 = vmatprep.mubr.msk.f32.mxu0 %vm825_vm0, %v826_v6  ;;  %773 = vmatprep.mubr.msk.f32.mxu1 %vm825_vm0, %v826_v6 }
  0x37   :  { %708 = vmatmul.mubr.msk.f32.gmra.mrb[20].mxu0 %vm70_vm1, %v24_v31  ;;  %774 = vmatmul.mubr.msk.f32.gmra.mrb[20].mxu1 %vm70_vm1, %v46_v32 }
  0x38   :  { %710 = vmatprep.mubr.msk.f32.mxu0 %vm825_vm0, %v826_v6  ;;  %776 = vmatprep.mubr.msk.f32.mxu1 %vm825_vm0, %v826_v6 }
  0x3b   :  { %711 = vmatmul.mubr.msk.f32.gmra.mrb[22].mxu0 %vm70_vm1, %v25_v33  ;;  %777 = vmatmul.mubr.msk.f32.gmra.mrb[22].mxu1 %vm70_vm1, %v47_v34 }
  0x3c   :  { %713 = vmatprep.mubr.msk.f32.mxu0 %vm825_vm0, %v826_v6  ;;  %779 = vmatprep.mubr.msk.f32.mxu1 %vm825_vm0, %v826_v6 }
  0x3f   :  { %714 = vmatmul.mubr.msk.f32.gmra.mrb[24].mxu0 %vm70_vm1, %v26_v35  ;;  %780 = vmatmul.mubr.msk.f32.gmra.mrb[24].mxu1 %vm70_vm1, %v48_v36 }
  0x40   :  { %716 = vmatprep.mubr.msk.f32.mxu0 %vm825_vm0, %v826_v6  ;;  %782 = vmatprep.mubr.msk.f32.mxu1 %vm825_vm0, %v826_v6 }
  0x43   :  { %717 = vmatmul.mubr.msk.f32.gmra.mrb[26].mxu0 %vm70_vm1, %v27_v37  ;;  %783 = vmatmul.mubr.msk.f32.gmra.mrb[26].mxu1 %vm70_vm1, %v49_v38 }
  0x44   :  { %719 = vmatprep.mubr.msk.f32.mxu0 %vm825_vm0, %v826_v6  ;;  %785 = vmatprep.mubr.msk.f32.mxu1 %vm825_vm0, %v826_v6 }
  0x47   :  { %720 = vmatmul.mubr.msk.f32.gmra.mrb[28].mxu0 %vm70_vm1, %v28_v39  ;;  %786 = vmatmul.mubr.msk.f32.gmra.mrb[28].mxu1 %vm70_vm1, %v50_v40 }
  0x48   :  { %722 = vmatprep.mubr.msk.f32.mxu0 %vm825_vm0, %v826_v6  ;;  %788 = vmatprep.mubr.msk.f32.mxu1 %vm825_vm0, %v826_v6 }
  0x4b   :  { %723 = vmatmul.mubr.msk.f32.gmra.mrb[30].mxu0 %vm70_vm1, %v29_v41  ;;  %789 = vmatmul.mubr.msk.f32.gmra.mrb[30].mxu1 %vm70_vm1, %v51_v42 }
  0x4c   :  { %725 = vmatprep.mubr.msk.f32.mxu0 %vm825_vm0, %v826_v6  ;;  %791 = vmatprep.mubr.msk.f32.mxu1 %vm825_vm0, %v826_v6 }
  0x4f   :  { %726 = vmatmul.mubr.msk.f32.gmra.mrb[32].mxu0 %vm70_vm1, %v30_v43  ;;  %792 = vmatmul.mubr.msk.f32.gmra.mrb[32].mxu1 %vm70_vm1, %v52_v44 }
  0x50   :  { %728 = vmatprep.mubr.msk.f32.mxu0 %vm825_vm0, %v826_v6  ;;  %794 = vmatprep.mubr.msk.f32.mxu1 %vm825_vm0, %v826_v6 }
  0x53   :  { %729 = vmatmul.mubr.msk.f32.gmra.mrb[34].mxu0 %vm70_vm1, %v31_v45  ;;  %795 = vmatmul.mubr.msk.f32.gmra.mrb[34].mxu1 %vm70_vm1, %v53_v46 }
  0x54   :  { %731 = vmatprep.mubr.msk.f32.mxu0 %vm825_vm0, %v826_v6  ;;  %797 = vmatprep.mubr.msk.f32.mxu1 %vm825_vm0, %v826_v6 }
  0x57   :  { %732 = vmatmul.mubr.msk.f32.gmra.mrb[36].mxu0 %vm70_vm1, %v32_v47  ;;  %798 = vmatmul.mubr.msk.f32.gmra.mrb[36].mxu1 %vm70_vm1, %v54_v48 }
  0x58   :  { %734 = vmatprep.mubr.msk.f32.mxu0 %vm825_vm0, %v826_v6  ;;  %800 = vmatprep.mubr.msk.f32.mxu1 %vm825_vm0, %v826_v6 }
  0x5b   :  { %735 = vmatmul.mubr.msk.f32.gmra.mrb[38].mxu0 %vm70_vm1, %v33_v49  ;;  %801 = vmatmul.mubr.msk.f32.gmra.mrb[38].mxu1 %vm70_vm1, %v55_v50 }
  0x5c   :  { %737 = vmatprep.mubr.msk.f32.mxu0 %vm825_vm0, %v826_v6  ;;  %803 = vmatprep.mubr.msk.f32.mxu1 %vm825_vm0, %v826_v6 }
  0x5f   :  { %738 = vmatmul.mubr.msk.f32.gmra.mrb[40].mxu0 %vm70_vm1, %v34_v51  ;;  %804 = vmatmul.mubr.msk.f32.gmra.mrb[40].mxu1 %vm70_vm1, %v56_v52 }
  0x60   :  { %740 = vmatprep.mubr.msk.f32.mxu0 %vm825_vm0, %v826_v6 }
  0x63   :  { %741 = vmatmul.mubr.msk.f32.gmra.mrb[42].mxu0 %vm70_vm1, %v35_v53 }
  0xe2   :  { %v266_v55 = vpop.f32.mrb[0].mxu0  ;;  %v376_v56 = vpop.f32.mrb[0].mxu1 }
  0xe3   :  { %v267_v57 = vadd.f32 %v1126_v54, %v266_v55  ;;  %v679_v58 = vpop.f32.mrb[1].mxu0  ;;  %v377_v59 = vadd.f32 %v1126_v54, %v376_v56  ;;  %v745_v60 = vpop.f32.mrb[1].mxu1 }
  0xe5   :  { %v480_v61 = vmax.f32 %v267_v57, 0.0  ;;  %v502_v62 = vmax.f32 %v377_v59, 0.0 }
  0xe6   :  { %v271_v63 = vpop.f32.mrb[2].mxu0  ;;  %v381_v0 = vpop.f32.mrb[2].mxu1 }
  0xe7   :  { %524 = vst.msk [vmem:[%s1345_s3] sm:$0xff] %vm523_vm2, %v480_v61  ;;  %546 = vst.msk [vmem:[%s1345_s3 + $0xb0] sm:$0xff] %vm523_vm2, %v502_v62  ;;  %v272_v1 = vadd.f32 %v1126_v54, %v271_v63  ;;  %v682_v2 = vpop.f32.mrb[3].mxu0  ;;  %v382_v3 = vadd.f32 %v1126_v54, %v381_v0  ;;  %v748_v4 = vpop.f32.mrb[3].mxu1 }
  0xe9   :  { %v481_v5 = vmax.f32 %v272_v1, 0.0  ;;  %v503_v6 = vmax.f32 %v382_v3, 0.0 }
  0xea   :  { %v276_v7 = vpop.f32.mrb[4].mxu0  ;;  %v386_v8 = vpop.f32.mrb[4].mxu1 }
  0xeb   :  { %525 = vst.msk [vmem:[%s1345_s3 + $0x8] sm:$0xff] %vm523_vm2, %v481_v5  ;;  %547 = vst.msk [vmem:[%s1345_s3 + $0xb8] sm:$0xff] %vm523_vm2, %v503_v6  ;;  %v277_v9 = vadd.f32 %v1126_v54, %v276_v7  ;;  %v685_v10 = vpop.f32.mrb[5].mxu0  ;;  %v387_v11 = vadd.f32 %v1126_v54, %v386_v8  ;;  %v751_v12 = vpop.f32.mrb[5].mxu1 }
  0xed   :  { %v482_v13 = vmax.f32 %v277_v9, 0.0  ;;  %v504_v14 = vmax.f32 %v387_v11, 0.0 }
  0xee   :  { %v281_v15 = vpop.f32.mrb[6].mxu0  ;;  %v391_v16 = vpop.f32.mrb[6].mxu1 }
  0xef   :  { %526 = vst.msk [vmem:[%s1345_s3 + $0x10] sm:$0xff] %vm523_vm2, %v482_v13  ;;  %548 = vst.msk [vmem:[%s1345_s3 + $0xc0] sm:$0xff] %vm523_vm2, %v504_v14  ;;  %v282_v17 = vadd.f32 %v1126_v54, %v281_v15  ;;  %v688_v18 = vpop.f32.mrb[7].mxu0  ;;  %v392_v19 = vadd.f32 %v1126_v54, %v391_v16  ;;  %v754_v20 = vpop.f32.mrb[7].mxu1 }
  0xf1   :  { %v483_v21 = vmax.f32 %v282_v17, 0.0  ;;  %v505_v22 = vmax.f32 %v392_v19, 0.0 }
  0xf2   :  { %v286_v23 = vpop.f32.mrb[8].mxu0  ;;  %v396_v24 = vpop.f32.mrb[8].mxu1 }
  0xf3   :  { %527 = vst.msk [vmem:[%s1345_s3 + $0x18] sm:$0xff] %vm523_vm2, %v483_v21  ;;  %549 = vst.msk [vmem:[%s1345_s3 + $0xc8] sm:$0xff] %vm523_vm2, %v505_v22  ;;  %v287_v25 = vadd.f32 %v1126_v54, %v286_v23  ;;  %v691_v26 = vpop.f32.mrb[9].mxu0  ;;  %v397_v27 = vadd.f32 %v1126_v54, %v396_v24  ;;  %v757_v28 = vpop.f32.mrb[9].mxu1 }
  0xf5   :  { %v484_v29 = vmax.f32 %v287_v25, 0.0  ;;  %v506_v30 = vmax.f32 %v397_v27, 0.0 }
  0xf6   :  { %v291_v31 = vpop.f32.mrb[10].mxu0  ;;  %v401_v32 = vpop.f32.mrb[10].mxu1 }
  0xf7   :  { %528 = vst.msk [vmem:[%s1345_s3 + $0x20] sm:$0xff] %vm523_vm2, %v484_v29  ;;  %550 = vst.msk [vmem:[%s1345_s3 + $0xd0] sm:$0xff] %vm523_vm2, %v506_v30  ;;  %v292_v33 = vadd.f32 %v1126_v54, %v291_v31  ;;  %v694_v34 = vpop.f32.mrb[11].mxu0  ;;  %v402_v35 = vadd.f32 %v1126_v54, %v401_v32  ;;  %v760_v36 = vpop.f32.mrb[11].mxu1 }
  0xf9   :  { %v485_v37 = vmax.f32 %v292_v33, 0.0  ;;  %v507_v38 = vmax.f32 %v402_v35, 0.0 }
  0xfa   :  { %v296_v39 = vpop.f32.mrb[12].mxu0  ;;  %v406_v40 = vpop.f32.mrb[12].mxu1 }
  0xfb   :  { %529 = vst.msk [vmem:[%s1345_s3 + $0x28] sm:$0xff] %vm523_vm2, %v485_v37  ;;  %551 = vst.msk [vmem:[%s1345_s3 + $0xd8] sm:$0xff] %vm523_vm2, %v507_v38  ;;  %v297_v41 = vadd.f32 %v1126_v54, %v296_v39  ;;  %v697_v42 = vpop.f32.mrb[13].mxu0  ;;  %v407_v43 = vadd.f32 %v1126_v54, %v406_v40  ;;  %v763_v44 = vpop.f32.mrb[13].mxu1 }
  0xfd   :  { %v486_v45 = vmax.f32 %v297_v41, 0.0  ;;  %v508_v46 = vmax.f32 %v407_v43, 0.0 }
  0xfe   :  { %v301_v47 = vpop.f32.mrb[14].mxu0  ;;  %v411_v48 = vpop.f32.mrb[14].mxu1 }
  0xff   :  { %530 = vst.msk [vmem:[%s1345_s3 + $0x30] sm:$0xff] %vm523_vm2, %v486_v45  ;;  %552 = vst.msk [vmem:[%s1345_s3 + $0xe0] sm:$0xff] %vm523_vm2, %v508_v46  ;;  %v302_v49 = vadd.f32 %v1126_v54, %v301_v47  ;;  %v700_v50 = vpop.f32.mrb[15].mxu0  ;;  %v412_v51 = vadd.f32 %v1126_v54, %v411_v48  ;;  %v766_v52 = vpop.f32.mrb[15].mxu1 }
 0x101   :  { %v487_v53 = vmax.f32 %v302_v49, 0.0  ;;  %v509_v55 = vmax.f32 %v412_v51, 0.0 }
 0x102   :  { %v306_v56 = vpop.f32.mrb[16].mxu0  ;;  %v416_v57 = vpop.f32.mrb[16].mxu1 }
 0x103   :  { %531 = vst.msk [vmem:[%s1345_s3 + $0x38] sm:$0xff] %vm523_vm2, %v487_v53  ;;  %553 = vst.msk [vmem:[%s1345_s3 + $0xe8] sm:$0xff] %vm523_vm2, %v509_v55  ;;  %v307_v58 = vadd.f32 %v1126_v54, %v306_v56  ;;  %v703_v59 = vpop.f32.mrb[17].mxu0  ;;  %v417_v60 = vadd.f32 %v1126_v54, %v416_v57  ;;  %v769_v61 = vpop.f32.mrb[17].mxu1 }
 0x105   :  { %v488_v62 = vmax.f32 %v307_v58, 0.0  ;;  %v510_v63 = vmax.f32 %v417_v60, 0.0 }
 0x106   :  { %v311_v0 = vpop.f32.mrb[18].mxu0  ;;  %v421_v1 = vpop.f32.mrb[18].mxu1 }
 0x107   :  { %532 = vst.msk [vmem:[%s1345_s3 + $0x40] sm:$0xff] %vm523_vm2, %v488_v62  ;;  %554 = vst.msk [vmem:[%s1345_s3 + $0xf0] sm:$0xff] %vm523_vm2, %v510_v63  ;;  %v312_v2 = vadd.f32 %v1126_v54, %v311_v0  ;;  %v706_v3 = vpop.f32.mrb[19].mxu0  ;;  %v422_v4 = vadd.f32 %v1126_v54, %v421_v1  ;;  %v772_v5 = vpop.f32.mrb[19].mxu1 }
 0x109   :  { %v489_v6 = vmax.f32 %v312_v2, 0.0  ;;  %v511_v7 = vmax.f32 %v422_v4, 0.0 }
 0x10a   :  { %v316_v8 = vpop.f32.mrb[20].mxu0  ;;  %v426_v9 = vpop.f32.mrb[20].mxu1 }
 0x10b   :  { %533 = vst.msk [vmem:[%s1345_s3 + $0x48] sm:$0xff] %vm523_vm2, %v489_v6  ;;  %555 = vst.msk [vmem:[%s1345_s3 + $0xf8] sm:$0xff] %vm523_vm2, %v511_v7  ;;  %v317_v10 = vadd.f32 %v1126_v54, %v316_v8  ;;  %v709_v11 = vpop.f32.mrb[21].mxu0  ;;  %v427_v12 = vadd.f32 %v1126_v54, %v426_v9  ;;  %v775_v13 = vpop.f32.mrb[21].mxu1 }
 0x10d   :  { %v490_v14 = vmax.f32 %v317_v10, 0.0  ;;  %v512_v15 = vmax.f32 %v427_v12, 0.0 }
 0x10e   :  { %v321_v16 = vpop.f32.mrb[22].mxu0  ;;  %v431_v17 = vpop.f32.mrb[22].mxu1 }
 0x10f   :  { %534 = vst.msk [vmem:[%s1345_s3 + $0x50] sm:$0xff] %vm523_vm2, %v490_v14  ;;  %556 = vst.msk [vmem:[%s1345_s3 + $0x100] sm:$0xff] %vm523_vm2, %v512_v15  ;;  %v322_v18 = vadd.f32 %v1126_v54, %v321_v16  ;;  %v712_v19 = vpop.f32.mrb[23].mxu0  ;;  %v432_v20 = vadd.f32 %v1126_v54, %v431_v17  ;;  %v778_v21 = vpop.f32.mrb[23].mxu1 }
 0x111   :  { %v491_v22 = vmax.f32 %v322_v18, 0.0  ;;  %v513_v23 = vmax.f32 %v432_v20, 0.0 }
 0x112   :  { %v326_v24 = vpop.f32.mrb[24].mxu0  ;;  %v436_v25 = vpop.f32.mrb[24].mxu1 }
 0x113   :  { %535 = vst.msk [vmem:[%s1345_s3 + $0x58] sm:$0xff] %vm523_vm2, %v491_v22  ;;  %557 = vst.msk [vmem:[%s1345_s3 + $0x108] sm:$0xff] %vm523_vm2, %v513_v23  ;;  %v327_v26 = vadd.f32 %v1126_v54, %v326_v24  ;;  %v715_v27 = vpop.f32.mrb[25].mxu0  ;;  %v437_v28 = vadd.f32 %v1126_v54, %v436_v25  ;;  %v781_v29 = vpop.f32.mrb[25].mxu1 }
 0x115   :  { %v492_v30 = vmax.f32 %v327_v26, 0.0  ;;  %v514_v31 = vmax.f32 %v437_v28, 0.0 }
 0x116   :  { %v331_v32 = vpop.f32.mrb[26].mxu0  ;;  %v441_v33 = vpop.f32.mrb[26].mxu1 }
 0x117   :  { %536 = vst.msk [vmem:[%s1345_s3 + $0x60] sm:$0xff] %vm523_vm2, %v492_v30  ;;  %558 = vst.msk [vmem:[%s1345_s3 + $0x110] sm:$0xff] %vm523_vm2, %v514_v31  ;;  %v332_v34 = vadd.f32 %v1126_v54, %v331_v32  ;;  %v718_v35 = vpop.f32.mrb[27].mxu0  ;;  %v442_v36 = vadd.f32 %v1126_v54, %v441_v33  ;;  %v784_v37 = vpop.f32.mrb[27].mxu1 }
 0x119   :  { %v493_v38 = vmax.f32 %v332_v34, 0.0  ;;  %v515_v39 = vmax.f32 %v442_v36, 0.0 }
 0x11a   :  { %v336_v40 = vpop.f32.mrb[28].mxu0  ;;  %v446_v41 = vpop.f32.mrb[28].mxu1 }
 0x11b   :  { %537 = vst.msk [vmem:[%s1345_s3 + $0x68] sm:$0xff] %vm523_vm2, %v493_v38  ;;  %559 = vst.msk [vmem:[%s1345_s3 + $0x118] sm:$0xff] %vm523_vm2, %v515_v39  ;;  %v337_v42 = vadd.f32 %v1126_v54, %v336_v40  ;;  %v721_v43 = vpop.f32.mrb[29].mxu0  ;;  %v447_v44 = vadd.f32 %v1126_v54, %v446_v41  ;;  %v787_v45 = vpop.f32.mrb[29].mxu1 }
 0x11d   :  { %v494_v46 = vmax.f32 %v337_v42, 0.0  ;;  %v516_v47 = vmax.f32 %v447_v44, 0.0 }
 0x11e   :  { %v341_v48 = vpop.f32.mrb[30].mxu0  ;;  %v451_v49 = vpop.f32.mrb[30].mxu1 }
 0x11f   :  { %538 = vst.msk [vmem:[%s1345_s3 + $0x70] sm:$0xff] %vm523_vm2, %v494_v46  ;;  %560 = vst.msk [vmem:[%s1345_s3 + $0x120] sm:$0xff] %vm523_vm2, %v516_v47  ;;  %v342_v50 = vadd.f32 %v1126_v54, %v341_v48  ;;  %v724_v51 = vpop.f32.mrb[31].mxu0  ;;  %v452_v52 = vadd.f32 %v1126_v54, %v451_v49  ;;  %v790_v53 = vpop.f32.mrb[31].mxu1 }
 0x121   :  { %v495_v55 = vmax.f32 %v342_v50, 0.0  ;;  %v517_v56 = vmax.f32 %v452_v52, 0.0 }
 0x122   :  { %v346_v57 = vpop.f32.mrb[32].mxu0  ;;  %v456_v58 = vpop.f32.mrb[32].mxu1 }
 0x123   :  { %539 = vst.msk [vmem:[%s1345_s3 + $0x78] sm:$0xff] %vm523_vm2, %v495_v55  ;;  %561 = vst.msk [vmem:[%s1345_s3 + $0x128] sm:$0xff] %vm523_vm2, %v517_v56  ;;  %v347_v59 = vadd.f32 %v1126_v54, %v346_v57  ;;  %v727_v60 = vpop.f32.mrb[33].mxu0  ;;  %v457_v61 = vadd.f32 %v1126_v54, %v456_v58  ;;  %v793_v62 = vpop.f32.mrb[33].mxu1 }
 0x125   :  { %v496_v63 = vmax.f32 %v347_v59, 0.0  ;;  %v518_v0 = vmax.f32 %v457_v61, 0.0 }
 0x126   :  { %v351_v1 = vpop.f32.mrb[34].mxu0  ;;  %v461_v2 = vpop.f32.mrb[34].mxu1 }
 0x127   :  { %540 = vst.msk [vmem:[%s1345_s3 + $0x80] sm:$0xff] %vm523_vm2, %v496_v63  ;;  %562 = vst.msk [vmem:[%s1345_s3 + $0x130] sm:$0xff] %vm523_vm2, %v518_v0  ;;  %v352_v3 = vadd.f32 %v1126_v54, %v351_v1  ;;  %v730_v4 = vpop.f32.mrb[35].mxu0  ;;  %v462_v5 = vadd.f32 %v1126_v54, %v461_v2  ;;  %v796_v6 = vpop.f32.mrb[35].mxu1 }
 0x129   :  { %v497_v7 = vmax.f32 %v352_v3, 0.0  ;;  %v519_v8 = vmax.f32 %v462_v5, 0.0 }
 0x12a   :  { %v356_v9 = vpop.f32.mrb[36].mxu0  ;;  %v466_v10 = vpop.f32.mrb[36].mxu1 }
 0x12b   :  { %541 = vst.msk [vmem:[%s1345_s3 + $0x88] sm:$0xff] %vm523_vm2, %v497_v7  ;;  %563 = vst.msk [vmem:[%s1345_s3 + $0x138] sm:$0xff] %vm523_vm2, %v519_v8  ;;  %v357_v11 = vadd.f32 %v1126_v54, %v356_v9  ;;  %v733_v12 = vpop.f32.mrb[37].mxu0  ;;  %v467_v13 = vadd.f32 %v1126_v54, %v466_v10  ;;  %v799_v14 = vpop.f32.mrb[37].mxu1 }
 0x12d   :  { %v498_v15 = vmax.f32 %v357_v11, 0.0  ;;  %v520_v16 = vmax.f32 %v467_v13, 0.0 }
 0x12e   :  { %v361_v17 = vpop.f32.mrb[38].mxu0  ;;  %v471_v18 = vpop.f32.mrb[38].mxu1 }
 0x12f   :  { %542 = vst.msk [vmem:[%s1345_s3 + $0x90] sm:$0xff] %vm523_vm2, %v498_v15  ;;  %564 = vst.msk [vmem:[%s1345_s3 + $0x140] sm:$0xff] %vm523_vm2, %v520_v16  ;;  %v362_v19 = vadd.f32 %v1126_v54, %v361_v17  ;;  %v736_v20 = vpop.f32.mrb[39].mxu0  ;;  %v472_v21 = vadd.f32 %v1126_v54, %v471_v18  ;;  %v802_v22 = vpop.f32.mrb[39].mxu1 }
 0x131   :  { %v499_v23 = vmax.f32 %v362_v19, 0.0  ;;  %v521_v24 = vmax.f32 %v472_v21, 0.0 }
 0x132   :  { %v366_v25 = vpop.f32.mrb[40].mxu0  ;;  %v476_v26 = vpop.f32.mrb[40].mxu1 }
 0x133   :  { %543 = vst.msk [vmem:[%s1345_s3 + $0x98] sm:$0xff] %vm523_vm2, %v499_v23  ;;  %565 = vst.msk [vmem:[%s1345_s3 + $0x148] sm:$0xff] %vm523_vm2, %v521_v24  ;;  %v367_v27 = vadd.f32 %v1126_v54, %v366_v25  ;;  %v739_v28 = vpop.f32.mrb[41].mxu0  ;;  %v477_v29 = vadd.f32 %v1126_v54, %v476_v26  ;;  %v805_v30 = vpop.f32.mrb[41].mxu1 }
 0x135   :  { %v500_v31 = vmax.f32 %v367_v27, 0.0  ;;  %v522_v32 = vmax.f32 %v477_v29, 0.0 }
 0x136   :  { %v371_v33 = vpop.f32.mrb[42].mxu0 }
 0x137   :  { %544 = vst.msk [vmem:[%s1345_s3 + $0xa0] sm:$0xff] %vm523_vm2, %v500_v31  ;;  %v372_v34 = vadd.f32 %v1126_v54, %v371_v33  ;;  %v742_v35 = vpop.f32.mrb[43].mxu0 }
 0x138   :  { %567 = vst.msk [vmem:[%s1345_s3 + $0x150] sm:$0x3] %vm566_vm3, %v522_v32 }
 0x139   :  { %v501_v36 = vmax.f32 %v372_v34, 0.0 }
 0x13b   :  { %545 = vst.msk [vmem:[%s1345_s3 + $0xa8] sm:$0xff] %vm523_vm2, %v501_v36 }

// kernel: vae_forward.3
= control target key start
LH: loop header
LB: loop body
LE: loop exit
PB: predicated region body
PF: predicated region fallthrough
CT: control target
= control target key end

     0   :  { %v5571_v21 = vmov 1983009808   ;;  %v52_v23 = vlaneseq  ;;  %vm5573_vm0 = vmmov 0   ;;  %vm3031_vm1 = vcmask 261120   ;;  %s6783_s1 = inlined_call_operand.vmem [shape: bf16[5408,64], index: 1, kind: input, shape index: {}]   ;;  %s6784_s0 = inlined_call_operand.vmem [shape: f32[2,5408], index: 0, kind: input, shape index: {}]   ;;  %s6785_s2 = inlined_call_operand.vmem [shape: f32[1,64], index: 2, kind: input, shape index: {}]   ;;  %s6786_s4 = inlined_call_operand.vmem [shape: bf16[32,800], index: 4, kind: input, shape index: {}]   ;;  %s6787_s7 = inlined_call_operand.vmem [shape: f32[2,64], index: 7, kind: output, shape index: {1}]   ;;  %s6788_s3 = inlined_call_operand.vmem [shape: f32[2,32], index: 3, kind: input, shape index: {}]   ;;  %s6789_s5 = inlined_call_operand.vmem [shape: f32[1,800], index: 5, kind: input, shape index: {}]   ;;  %s6790_s6 = inlined_call_operand.vmem [shape: f32[2,800], index: 6, kind: output, shape index: {0}]  }
   0x1   :  { %v5172_v0 = vld [vmem:[%s6783_s1 + $0x40] sm:$0xff]   ;;  %v5176_v4 = vld [vmem:[%s6783_s1 + $0x48] sm:$0xff]   ;;  %v5180_v8 = vld [vmem:[%s6783_s1 + $0x50] sm:$0xff]   ;;  %v50_v22 = vunpack.c.l.s4 %v5571_v21  ;;  %vm3925_vm2 = vcmask 517120   ;;  %vm4304_vm3 = vcmask 1041408   ;;  %vm4305_vm4 = vcmask 1043458  }
   0x2   :  { %v5173_v1 = vld [vmem:[%s6783_s1] sm:$0xff]   ;;  %4683 = vmatprep.subr.bf16.mxu0 %v5172_v0  ;;  %v5177_v5 = vld [vmem:[%s6783_s1 + $0x8] sm:$0xff]   ;;  %v5181_v9 = vld [vmem:[%s6783_s1 + $0x10] sm:$0xff]   ;;  %v5691_v29 = vshrl.u32 %v52_v23, 7  ;;  %vm4307_vm6 = vcmask 259076  }
   0x3   :  { %v5174_v2 = vld [vmem:[%s6783_s1 + $0xc0] sm:$0xff]   ;;  %4684 = vmatpush3.bf16.msra.mxu0 %v5173_v1  ;;  %v5178_v6 = vld [vmem:[%s6783_s1 + $0xc8] sm:$0xff]   ;;  %v5182_v10 = vld [vmem:[%s6783_s1 + $0xd0] sm:$0xff]   ;;  %v51_v28 = vunpack.c.0.s8 %v50_v22 }
   0x4   :  { %v5175_v3 = vld [vmem:[%s6783_s1 + $0x80] sm:$0xff]   ;;  %4705 = vmatprep.subr.bf16.mxu1 %v5174_v2  ;;  %4685 = vmatprep.subr.bf16.mxu0 %v5176_v4  ;;  %v5179_v7 = vld [vmem:[%s6783_s1 + $0x88] sm:$0xff]   ;;  %v5183_v11 = vld [vmem:[%s6783_s1 + $0x90] sm:$0xff]  }
   0x5   :  { %4706 = vmatpush3.bf16.msra.mxu1 %v5175_v3  ;;  %v5184_v12 = vld [vmem:[%s6783_s1 + $0x58] sm:$0xff]   ;;  %v5188_v16 = vld [vmem:[%s6783_s1 + $0x60] sm:$0xff]   ;;  %v5192_v20 = vld [vmem:[%s6783_s1 + $0x68] sm:$0xff]   ;;  %v5706_v34 = vsub.s32 %v51_v28, %v5691_v29 }
   0x6   :  { %4707 = vmatprep.subr.bf16.mxu1 %v5178_v6  ;;  %v5185_v13 = vld [vmem:[%s6783_s1 + $0x18] sm:$0xff]   ;;  %v5189_v17 = vld [vmem:[%s6783_s1 + $0x20] sm:$0xff]   ;;  %v5193_v24 = vld [vmem:[%s6783_s1 + $0x28] sm:$0xff]  }
   0x7   :  { %4686 = vmatpush3.bf16.msra.mxu0 %v5177_v5  ;;  %v5186_v14 = vld [vmem:[%s6783_s1 + $0xd8] sm:$0xff]   ;;  %v5190_v18 = vld [vmem:[%s6783_s1 + $0xe0] sm:$0xff]   ;;  %v5194_v25 = vld [vmem:[%s6783_s1 + $0xe8] sm:$0xff]  }
   0x8   :  { %4687 = vmatprep.subr.bf16.mxu0 %v5180_v8  ;;  %v5187_v15 = vld [vmem:[%s6783_s1 + $0x98] sm:$0xff]   ;;  %v5191_v19 = vld [vmem:[%s6783_s1 + $0xa0] sm:$0xff]   ;;  %v5195_v26 = vld [vmem:[%s6783_s1 + $0xa8] sm:$0xff]  }
   0x9   :  { %4708 = vmatpush3.bf16.msra.mxu1 %v5179_v7  ;;  %v5196_v27 = vld [vmem:[%s6783_s1 + $0x70] sm:$0xff]   ;;  %v5200_v33 = vld [vmem:[%s6783_s1 + $0x78] sm:$0xff]   ;;  %v26_v37 = vld [vmem:[%s6784_s0] sm:$0xff] }
   0xa   :  { %4709 = vmatprep.subr.bf16.mxu1 %v5182_v10  ;;  %v5197_v30 = vld [vmem:[%s6783_s1 + $0x30] sm:$0xff]   ;;  %v5201_v35 = vld [vmem:[%s6783_s1 + $0x38] sm:$0xff]   ;;  %v55_v38 = vrot.slane %v26_v37, %v5706_v34  ;;  %v48_v40 = vcombine.high %v26_v37, %v26_v37  ;;  %v5204_v41 = vld [vmem:[%s6783_s1 + $0x140] sm:$0xff]  }
   0xb   :  { %4688 = vmatpush3.bf16.msra.mxu0 %v5181_v9  ;;  %v5198_v31 = vld [vmem:[%s6783_s1 + $0xf0] sm:$0xff]   ;;  %v5202_v36 = vld [vmem:[%s6783_s1 + $0xf8] sm:$0xff]   ;;  %v5206_v44 = vld [vmem:[%s6783_s1 + $0x100] sm:$0xff]  }
   0xc   :  { %4689 = vmatprep.subr.bf16.mxu0 %v5184_v12  ;;  %v5199_v32 = vld [vmem:[%s6783_s1 + $0xb0] sm:$0xff]   ;;  %v5203_v39 = vld [vmem:[%s6783_s1 + $0xb8] sm:$0xff]   ;;  %v63_v42 = vcombine.high %v55_v38, %v55_v38  ;;  %v62_v43 = vrot.slane %v48_v40, %v5706_v34  ;;  %v277_v45 = vpack.c.bf16 %v55_v38, %v55_v38  ;;  %v5207_v46 = vld [vmem:[%s6783_s1 + $0x1c0] sm:$0xff]  }
   0xd   :  { %4710 = vmatpush3.bf16.msra.mxu1 %v5183_v11  ;;  %v5208_v49 = vld [vmem:[%s6783_s1 + $0x180] sm:$0xff]   ;;  %v5209_v51 = vld [vmem:[%s6783_s1 + $0x148] sm:$0xff]   ;;  %v5213_v56 = vld [vmem:[%s6783_s1 + $0x150] sm:$0xff]  }
   0xe   :  { %4711 = vmatprep.subr.bf16.mxu1 %v5186_v14  ;;  %v278_v47 = vpack.c.bf16 %v63_v42, %v63_v42  ;;  %v64_v48 = vcombine.high %v62_v43, %v62_v43  ;;  %v279_v50 = vpack.c.bf16 %v62_v43, %v62_v43  ;;  %v5210_v53 = vld [vmem:[%s6783_s1 + $0x108] sm:$0xff]   ;;  %v5214_v57 = vld [vmem:[%s6783_s1 + $0x110] sm:$0xff]   ;;  %v5217_v60 = vld [vmem:[%s6783_s1 + $0x158] sm:$0xff]  }
   0xf   :  { %4690 = vmatpush3.bf16.msra.mxu0 %v5185_v13  ;;  %v5211_v54 = vld [vmem:[%s6783_s1 + $0x1c8] sm:$0xff]   ;;  %v5215_v58 = vld [vmem:[%s6783_s1 + $0x1d0] sm:$0xff]   ;;  %v5218_v61 = vld [vmem:[%s6783_s1 + $0x118] sm:$0xff]  }
  0x10   :  { %4691 = vmatprep.subr.bf16.mxu0 %v5188_v16  ;;  %3067 = vmatprep.mubr.bf16.mxu0 %v278_v47  ;;  %v280_v52 = vpack.c.bf16 %v64_v48, %v64_v48  ;;  %v5212_v55 = vld [vmem:[%s6783_s1 + $0x188] sm:$0xff]   ;;  %v5216_v59 = vld [vmem:[%s6783_s1 + $0x190] sm:$0xff]   ;;  %v5219_v62 = vld [vmem:[%s6783_s1 + $0x1d8] sm:$0xff]  }
  0x11   :  { %4712 = vmatpush3.bf16.msra.mxu1 %v5187_v15  ;;  %v5220_v63 = vld [vmem:[%s6783_s1 + $0x198] sm:$0xff]   ;;  %v5221_v0 = vld [vmem:[%s6783_s1 + $0x160] sm:$0xff]   ;;  %v5225_v4 = vld [vmem:[%s6783_s1 + $0x168] sm:$0xff]  }
  0x12   :  { %4713 = vmatprep.subr.bf16.mxu1 %v5190_v18  ;;  %3107 = vmatprep.mubr.bf16.mxu1 %v280_v52  ;;  %v5222_v1 = vld [vmem:[%s6783_s1 + $0x120] sm:$0xff]   ;;  %v5226_v5 = vld [vmem:[%s6783_s1 + $0x128] sm:$0xff]   ;;  %v5229_v8 = vld [vmem:[%s6783_s1 + $0x170] sm:$0xff]  }
  0x13   :  { %4692 = vmatpush3.bf16.msra.mxu0 %v5189_v17  ;;  %v5223_v2 = vld [vmem:[%s6783_s1 + $0x1e0] sm:$0xff]   ;;  %v5227_v6 = vld [vmem:[%s6783_s1 + $0x1e8] sm:$0xff]   ;;  %v5230_v9 = vld [vmem:[%s6783_s1 + $0x130] sm:$0xff]  }
  0x14   :  { %4693 = vmatprep.subr.bf16.mxu0 %v5192_v20  ;;  %v5224_v3 = vld [vmem:[%s6783_s1 + $0x1a0] sm:$0xff]   ;;  %v5228_v7 = vld [vmem:[%s6783_s1 + $0x1a8] sm:$0xff]   ;;  %v5231_v10 = vld [vmem:[%s6783_s1 + $0x1f0] sm:$0xff]  }
  0x15   :  { %4714 = vmatpush3.bf16.msra.mxu1 %v5191_v19  ;;  %v5232_v11 = vld [vmem:[%s6783_s1 + $0x1b0] sm:$0xff]   ;;  %v5233_v12 = vld [vmem:[%s6783_s1 + $0x178] sm:$0xff]   ;;  %v27_v15 = vld [vmem:[%s6784_s0 + $0x8] sm:$0xff] }
  0x16   :  { %4715 = vmatprep.subr.bf16.mxu1 %v5194_v25  ;;  %v5234_v13 = vld [vmem:[%s6783_s1 + $0x138] sm:$0xff]   ;;  %v72_v16 = vrot.slane %v27_v15, %v5706_v34  ;;  %v65_v18 = vcombine.high %v27_v15, %v27_v15  ;;  %v5237_v19 = vld [vmem:[%s6783_s1 + $0x240] sm:$0xff]   ;;  %v5247_v37 = vld [vmem:[%s6783_s1 + $0x210] sm:$0xff]  }
  0x17   :  { %4694 = vmatpush3.bf16.msra.mxu0 %v5193_v24  ;;  %v5235_v14 = vld [vmem:[%s6783_s1 + $0x1f8] sm:$0xff]   ;;  %v5239_v22 = vld [vmem:[%s6783_s1 + $0x200] sm:$0xff]   ;;  %v5248_v38 = vld [vmem:[%s6783_s1 + $0x2d0] sm:$0xff]  }
  0x18   :  { %4695 = vmatprep.subr.bf16.mxu0 %v5196_v27  ;;  %v5236_v17 = vld [vmem:[%s6783_s1 + $0x1b8] sm:$0xff]   ;;  %v80_v20 = vcombine.high %v72_v16, %v72_v16  ;;  %v79_v21 = vrot.slane %v65_v18, %v5706_v34  ;;  %v281_v23 = vpack.c.bf16 %v72_v16, %v72_v16  ;;  %v5240_v24 = vld [vmem:[%s6783_s1 + $0x2c0] sm:$0xff]   ;;  %v5258_v48 = vld [vmem:[%s6783_s1 + $0x268] sm:$0xff]  }
  0x19   :  { %4716 = vmatpush3.bf16.msra.mxu1 %v5195_v26  ;;  %v5241_v27 = vld [vmem:[%s6783_s1 + $0x280] sm:$0xff]   ;;  %v5250_v40 = vld [vmem:[%s6783_s1 + $0x258] sm:$0xff]   ;;  %v5262_v52 = vld [vmem:[%s6783_s1 + $0x270] sm:$0xff]  }
  0x1a   :  { %4717 = vmatprep.subr.bf16.mxu1 %v5198_v31  ;;  %v282_v25 = vpack.c.bf16 %v80_v20, %v80_v20  ;;  %v81_v26 = vcombine.high %v79_v21, %v79_v21  ;;  %v283_v28 = vpack.c.bf16 %v79_v21, %v79_v21  ;;  %v5252_v42 = vld [vmem:[%s6783_s1 + $0x2d8] sm:$0xff]   ;;  %v5257_v47 = vld [vmem:[%s6783_s1 + $0x2a0] sm:$0xff]   ;;  %v5280_v15 = vld [vmem:[%s6783_s1 + $0x310] sm:$0xff]  }
  0x1b   :  { %4696 = vmatpush3.bf16.msra.mxu0 %v5197_v30  ;;  %v5242_v30 = vld [vmem:[%s6783_s1 + $0x248] sm:$0xff]   ;;  %v5253_v43 = vld [vmem:[%s6783_s1 + $0x298] sm:$0xff]   ;;  %v5281_v16 = vld [vmem:[%s6783_s1 + $0x3d0] sm:$0xff]  }
  0x1c   :  { %4697 = vmatprep.subr.bf16.mxu0 %v5200_v33  ;;  %v284_v31 = vpack.c.bf16 %v81_v26, %v81_v26  ;;  %v5244_v33 = vld [vmem:[%s6783_s1 + $0x2c8] sm:$0xff]   ;;  %v5283_v18 = vld [vmem:[%s6783_s1 + $0x358] sm:$0xff]   ;;  %vm4306_vm5 = vmor %vm4305_vm4, %vm4304_vm3 }
  0x1d   :  { %4718 = vmatpush3.bf16.msra.mxu1 %v5199_v32  ;;  %v5243_v32 = vld [vmem:[%s6783_s1 + $0x208] sm:$0xff]   ;;  %v5285_v20 = vld [vmem:[%s6783_s1 + $0x3d8] sm:$0xff]   ;;  %vm4308_vm7 = vmor %vm4307_vm6, %vm4306_vm5 }
  0x1e   :  { %4719 = vmatprep.subr.bf16.mxu1 %v5202_v36  ;;  %v5246_v36 = vld [vmem:[%s6783_s1 + $0x250] sm:$0xff]   ;;  %v5286_v21 = vld [vmem:[%s6783_s1 + $0x398] sm:$0xff]   ;;  %v5291_v26 = vld [vmem:[%s6783_s1 + $0x368] sm:$0xff]  }
  0x1f   :  { %4698 = vmatpush3.bf16.msra.mxu0 %v5201_v35  ;;  %v5245_v35 = vld [vmem:[%s6783_s1 + $0x288] sm:$0xff]  }
  0x20   :  { %4727 = vmatprep.subr.bf16.mxu0 %v5204_v41  ;;  %v5251_v41 = vld [vmem:[%s6783_s1 + $0x218] sm:$0xff]  }
  0x21   :  { %4720 = vmatpush3.bf16.msra.mxu1 %v5203_v39  ;;  %v5249_v39 = vld [vmem:[%s6783_s1 + $0x290] sm:$0xff]  }
  0x22   :  { %4749 = vmatprep.subr.bf16.mxu1 %v5207_v46  ;;  %3068 = vmatmul.mubr.bf16.vlgmr.msra.gmra.mrb[0].mxu0 %v277_v45  ;;  %v5255_v45 = vld [vmem:[%s6783_s1 + $0x220] sm:$0xff]  }
  0x23   :  { %4728 = vmatpush3.bf16.msra.mxu0 %v5206_v44  ;;  %3147 = vmatprep.mubr.bf16.mxu0 %v282_v25  ;;  %v5254_v44 = vld [vmem:[%s6783_s1 + $0x260] sm:$0xff]  }
  0x24   :  { %3108 = vmatmul.mubr.bf16.vlgmr.msra.gmra.mrb[0].mxu1 %v279_v50  ;;  %4729 = vmatprep.subr.bf16.mxu0 %v5209_v51  ;;  %v5256_v46 = vld [vmem:[%s6783_s1 + $0x2e0] sm:$0xff]   ;;  %v5260_v50 = vld [vmem:[%s6783_s1 + $0x2e8] sm:$0xff]  }
  0x25   :  { %4750 = vmatpush3.bf16.msra.mxu1 %v5208_v49  ;;  %3187 = vmatprep.mubr.bf16.mxu1 %v284_v31  ;;  %v5259_v49 = vld [vmem:[%s6783_s1 + $0x228] sm:$0xff]   ;;  %v5290_v25 = vld [vmem:[%s6783_s1 + $0x3a0] sm:$0xff]   ;;  %v5295_v31 = vld [vmem:[%s6783_s1 + $0x370] sm:$0xff]  }
  0x26   :  { %4751 = vmatprep.subr.bf16.mxu1 %v5211_v54  ;;  %v5261_v51 = vld [vmem:[%s6783_s1 + $0x2a8] sm:$0xff]   ;;  %v5264_v54 = vld [vmem:[%s6783_s1 + $0x2f0] sm:$0xff]  }
  0x27   :  { %4730 = vmatpush3.bf16.msra.mxu0 %v5210_v53  ;;  %v5263_v53 = vld [vmem:[%s6783_s1 + $0x230] sm:$0xff]  }
  0x28   :  { %4731 = vmatprep.subr.bf16.mxu0 %v5213_v56  ;;  %v5266_v56 = vld [vmem:[%s6783_s1 + $0x278] sm:$0xff]  }
  0x29   :  { %4752 = vmatpush3.bf16.msra.mxu1 %v5212_v55  ;;  %v5265_v55 = vld [vmem:[%s6783_s1 + $0x2b0] sm:$0xff]  }
  0x2a   :  { %4753 = vmatprep.subr.bf16.mxu1 %v5215_v58  ;;  %v5268_v58 = vld [vmem:[%s6783_s1 + $0x2f8] sm:$0xff]  }
  0x2b   :  { %4732 = vmatpush3.bf16.msra.mxu0 %v5214_v57  ;;  %v5267_v57 = vld [vmem:[%s6783_s1 + $0x238] sm:$0xff]  }
  0x2c   :  { %4733 = vmatprep.subr.bf16.mxu0 %v5217_v60 }
  0x2d   :  { %4754 = vmatpush3.bf16.msra.mxu1 %v5216_v59  ;;  %v28_v59 = vld [vmem:[%s6784_s0 + $0x10] sm:$0xff] }
  0x2e   :  { %4755 = vmatprep.subr.bf16.mxu1 %v5219_v62  ;;  %v89_v60 = vrot.slane %v28_v59, %v5706_v34  ;;  %v82_v62 = vcombine.high %v28_v59, %v28_v59  ;;  %v5313_v59 = vld [vmem:[%s6783_s1 + $0x410] sm:$0xff]  }
  0x2f   :  { %4734 = vmatpush3.bf16.msra.mxu0 %v5218_v61  ;;  %v5269_v61 = vld [vmem:[%s6783_s1 + $0x2b8] sm:$0xff]  }
  0x30   :  { %4735 = vmatprep.subr.bf16.mxu0 %v5221_v0  ;;  %v97_v0 = vcombine.high %v89_v60, %v89_v60 }
  0x31   :  { %4756 = vmatpush3.bf16.msra.mxu1 %v5220_v63  ;;  %v5270_v63 = vld [vmem:[%s6783_s1 + $0x340] sm:$0xff]  }
  0x32   :  { %4757 = vmatprep.subr.bf16.mxu1 %v5223_v2  ;;  %v5272_v2 = vld [vmem:[%s6783_s1 + $0x300] sm:$0xff]  }
  0x33   :  { %4736 = vmatpush3.bf16.msra.mxu0 %v5222_v1  ;;  %v96_v1 = vrot.slane %v82_v62, %v5706_v34  ;;  %v5316_v62 = vld [vmem:[%s6783_s1 + $0x458] sm:$0xff]  }
  0x34   :  { %4737 = vmatprep.subr.bf16.mxu0 %v5225_v4  ;;  %v5273_v4 = vld [vmem:[%s6783_s1 + $0x3c0] sm:$0xff]  }
  0x35   :  { %4758 = vmatpush3.bf16.msra.mxu1 %v5224_v3  ;;  %v285_v3 = vpack.c.bf16 %v89_v60, %v89_v60  ;;  %v5314_v60 = vld [vmem:[%s6783_s1 + $0x4d0] sm:$0xff]  }
  0x36   :  { %4759 = vmatprep.subr.bf16.mxu1 %v5227_v6  ;;  %v98_v6 = vcombine.high %v96_v1, %v96_v1 }
  0x37   :  { %4738 = vmatpush3.bf16.msra.mxu0 %v5226_v5  ;;  %v286_v5 = vpack.c.bf16 %v97_v0, %v97_v0  ;;  %v5318_v0 = vld [vmem:[%s6783_s1 + $0x4d8] sm:$0xff]  }
  0x38   :  { %4739 = vmatprep.subr.bf16.mxu0 %v5229_v8  ;;  %v287_v8 = vpack.c.bf16 %v96_v1, %v96_v1  ;;  %v5319_v1 = vld [vmem:[%s6783_s1 + $0x498] sm:$0xff]  }
  0x39   :  { %4760 = vmatpush3.bf16.msra.mxu1 %v5228_v7  ;;  %v5274_v7 = vld [vmem:[%s6783_s1 + $0x380] sm:$0xff]  }
  0x3a   :  { %4761 = vmatprep.subr.bf16.mxu1 %v5231_v10  ;;  %v288_v10 = vpack.c.bf16 %v98_v6, %v98_v6  ;;  %v5324_v6 = vld [vmem:[%s6783_s1 + $0x468] sm:$0xff]  }
  0x3b   :  { %4740 = vmatpush3.bf16.msra.mxu0 %v5230_v9  ;;  %v5275_v9 = vld [vmem:[%s6783_s1 + $0x348] sm:$0xff]  }
  0x3c   :  { %4741 = vmatprep.subr.bf16.mxu0 %v5233_v12  ;;  %v5277_v12 = vld [vmem:[%s6783_s1 + $0x3c8] sm:$0xff]  }
  0x3d   :  { %4762 = vmatpush3.bf16.msra.mxu1 %v5232_v11  ;;  %v5276_v11 = vld [vmem:[%s6783_s1 + $0x308] sm:$0xff]  }
  0x3e   :  { %4763 = vmatprep.subr.bf16.mxu1 %v5235_v14  ;;  %v5279_v14 = vld [vmem:[%s6783_s1 + $0x350] sm:$0xff]  }
  0x3f   :  { %4742 = vmatpush3.bf16.msra.mxu0 %v5234_v13  ;;  %v5278_v13 = vld [vmem:[%s6783_s1 + $0x388] sm:$0xff]  }
  0x40   :  { %4771 = vmatprep.subr.bf16.mxu0 %v5237_v19  ;;  %v5284_v19 = vld [vmem:[%s6783_s1 + $0x318] sm:$0xff]  }
  0x41   :  { %4764 = vmatpush3.bf16.msra.mxu1 %v5236_v17  ;;  %v5282_v17 = vld [vmem:[%s6783_s1 + $0x390] sm:$0xff]  }
  0x42   :  { %3148 = vmatmul.mubr.bf16.vlgmr.msra.gmra.mrb[4].mxu0 %v281_v23  ;;  %4793 = vmatprep.subr.bf16.mxu1 %v5240_v24  ;;  %v5288_v23 = vld [vmem:[%s6783_s1 + $0x320] sm:$0xff]  }
  0x43   :  { %4772 = vmatpush3.bf16.msra.mxu0 %v5239_v22  ;;  %3227 = vmatprep.mubr.bf16.mxu0 %v286_v5  ;;  %v5287_v22 = vld [vmem:[%s6783_s1 + $0x360] sm:$0xff]  }
  0x44   :  { %3188 = vmatmul.mubr.bf16.vlgmr.msra.gmra.mrb[4].mxu1 %v283_v28  ;;  %4773 = vmatprep.subr.bf16.mxu0 %v5242_v30  ;;  %v5289_v24 = vld [vmem:[%s6783_s1 + $0x3e0] sm:$0xff]   ;;  %v5293_v28 = vld [vmem:[%s6783_s1 + $0x3e8] sm:$0xff]  }
  0x45   :  { %4794 = vmatpush3.bf16.msra.mxu1 %v5241_v27  ;;  %3267 = vmatprep.mubr.bf16.mxu1 %v288_v10  ;;  %v5292_v27 = vld [vmem:[%s6783_s1 + $0x328] sm:$0xff]   ;;  %v5323_v5 = vld [vmem:[%s6783_s1 + $0x4a0] sm:$0xff]   ;;  %v5328_v10 = vld [vmem:[%s6783_s1 + $0x470] sm:$0xff]  }
  0x46   :  { %4795 = vmatprep.subr.bf16.mxu1 %v5244_v33  ;;  %v5294_v30 = vld [vmem:[%s6783_s1 + $0x3a8] sm:$0xff]   ;;  %v5297_v33 = vld [vmem:[%s6783_s1 + $0x3f0] sm:$0xff]  }
  0x47   :  { %4774 = vmatpush3.bf16.msra.mxu0 %v5243_v32  ;;  %v5296_v32 = vld [vmem:[%s6783_s1 + $0x330] sm:$0xff]  }
  0x48   :  { %4775 = vmatprep.subr.bf16.mxu0 %v5246_v36  ;;  %v5299_v36 = vld [vmem:[%s6783_s1 + $0x378] sm:$0xff]  }
  0x49   :  { %4796 = vmatpush3.bf16.msra.mxu1 %v5245_v35  ;;  %v5298_v35 = vld [vmem:[%s6783_s1 + $0x3b0] sm:$0xff]  }
  0x4a   :  { %4797 = vmatprep.subr.bf16.mxu1 %v5248_v38  ;;  %v5301_v38 = vld [vmem:[%s6783_s1 + $0x3f8] sm:$0xff]  }
  0x4b   :  { %4776 = vmatpush3.bf16.msra.mxu0 %v5247_v37  ;;  %v5300_v37 = vld [vmem:[%s6783_s1 + $0x338] sm:$0xff]  }
  0x4c   :  { %4777 = vmatprep.subr.bf16.mxu0 %v5250_v40 }
  0x4d   :  { %4798 = vmatpush3.bf16.msra.mxu1 %v5249_v39  ;;  %v29_v39 = vld [vmem:[%s6784_s0 + $0x18] sm:$0xff] }
  0x4e   :  { %4799 = vmatprep.subr.bf16.mxu1 %v5252_v42  ;;  %v106_v40 = vrot.slane %v29_v39, %v5706_v34  ;;  %v99_v42 = vcombine.high %v29_v39, %v29_v39  ;;  %v5346_v39 = vld [vmem:[%s6783_s1 + $0x510] sm:$0xff]  }
  0x4f   :  { %4778 = vmatpush3.bf16.msra.mxu0 %v5251_v41  ;;  %v5302_v41 = vld [vmem:[%s6783_s1 + $0x3b8] sm:$0xff]  }
  0x50   :  { %4779 = vmatprep.subr.bf16.mxu0 %v5254_v44  ;;  %v114_v44 = vcombine.high %v106_v40, %v106_v40 }
  0x51   :  { %4800 = vmatpush3.bf16.msra.mxu1 %v5253_v43  ;;  %v5303_v43 = vld [vmem:[%s6783_s1 + $0x440] sm:$0xff]  }
  0x52   :  { %4801 = vmatprep.subr.bf16.mxu1 %v5256_v46  ;;  %v5305_v46 = vld [vmem:[%s6783_s1 + $0x400] sm:$0xff]  }
  0x53   :  { %4780 = vmatpush3.bf16.msra.mxu0 %v5255_v45  ;;  %v113_v45 = vrot.slane %v99_v42, %v5706_v34  ;;  %v5349_v42 = vld [vmem:[%s6783_s1 + $0x558] sm:$0xff]  }
  0x54   :  { %4781 = vmatprep.subr.bf16.mxu0 %v5258_v48  ;;  %v5306_v48 = vld [vmem:[%s6783_s1 + $0x4c0] sm:$0xff]  }
  0x55   :  { %4802 = vmatpush3.bf16.msra.mxu1 %v5257_v47  ;;  %v289_v47 = vpack.c.bf16 %v106_v40, %v106_v40  ;;  %v5347_v40 = vld [vmem:[%s6783_s1 + $0x5d0] sm:$0xff]  }
  0x56   :  { %4803 = vmatprep.subr.bf16.mxu1 %v5260_v50  ;;  %v115_v50 = vcombine.high %v113_v45, %v113_v45 }
  0x57   :  { %4782 = vmatpush3.bf16.msra.mxu0 %v5259_v49  ;;  %v290_v49 = vpack.c.bf16 %v114_v44, %v114_v44  ;;  %v5351_v44 = vld [vmem:[%s6783_s1 + $0x5d8] sm:$0xff]  }
  0x58   :  { %4783 = vmatprep.subr.bf16.mxu0 %v5262_v52  ;;  %v291_v52 = vpack.c.bf16 %v113_v45, %v113_v45  ;;  %v5352_v45 = vld [vmem:[%s6783_s1 + $0x598] sm:$0xff]  }
  0x59   :  { %4804 = vmatpush3.bf16.msra.mxu1 %v5261_v51  ;;  %v5307_v51 = vld [vmem:[%s6783_s1 + $0x480] sm:$0xff]  }
  0x5a   :  { %4805 = vmatprep.subr.bf16.mxu1 %v5264_v54  ;;  %v292_v54 = vpack.c.bf16 %v115_v50, %v115_v50  ;;  %v5357_v50 = vld [vmem:[%s6783_s1 + $0x568] sm:$0xff]  }
  0x5b   :  { %4784 = vmatpush3.bf16.msra.mxu0 %v5263_v53  ;;  %v5308_v53 = vld [vmem:[%s6783_s1 + $0x448] sm:$0xff]  }
  0x5c   :  { %4785 = vmatprep.subr.bf16.mxu0 %v5266_v56  ;;  %v5310_v56 = vld [vmem:[%s6783_s1 + $0x4c8] sm:$0xff]  }
  0x5d   :  { %4806 = vmatpush3.bf16.msra.mxu1 %v5265_v55  ;;  %v5309_v55 = vld [vmem:[%s6783_s1 + $0x408] sm:$0xff]  }
  0x5e   :  { %4807 = vmatprep.subr.bf16.mxu1 %v5268_v58  ;;  %v5312_v58 = vld [vmem:[%s6783_s1 + $0x450] sm:$0xff]  }
  0x5f   :  { %4786 = vmatpush3.bf16.msra.mxu0 %v5267_v57  ;;  %v5311_v57 = vld [vmem:[%s6783_s1 + $0x488] sm:$0xff]  }
  0x60   :  { %4815 = vmatprep.subr.bf16.mxu0 %v5270_v63  ;;  %v5317_v63 = vld [vmem:[%s6783_s1 + $0x418] sm:$0xff]  }
  0x61   :  { %4808 = vmatpush3.bf16.msra.mxu1 %v5269_v61  ;;  %v5315_v61 = vld [vmem:[%s6783_s1 + $0x490] sm:$0xff]  }
  0x62   :  { %3228 = vmatmul.mubr.bf16.vlgmr.msra.gmra.mrb[8].mxu0 %v285_v3  ;;  %4837 = vmatprep.subr.bf16.mxu1 %v5273_v4  ;;  %v5321_v3 = vld [vmem:[%s6783_s1 + $0x420] sm:$0xff]  }
  0x63   :  { %4816 = vmatpush3.bf16.msra.mxu0 %v5272_v2  ;;  %3307 = vmatprep.mubr.bf16.mxu0 %v290_v49  ;;  %v5320_v2 = vld [vmem:[%s6783_s1 + $0x460] sm:$0xff]  }
  0x64   :  { %3268 = vmatmul.mubr.bf16.vlgmr.msra.gmra.mrb[8].mxu1 %v287_v8  ;;  %4817 = vmatprep.subr.bf16.mxu0 %v5275_v9  ;;  %v5322_v4 = vld [vmem:[%s6783_s1 + $0x4e0] sm:$0xff]   ;;  %v5326_v8 = vld [vmem:[%s6783_s1 + $0x4e8] sm:$0xff]  }
  0x65   :  { %4838 = vmatpush3.bf16.msra.mxu1 %v5274_v7  ;;  %3347 = vmatprep.mubr.bf16.mxu1 %v292_v54  ;;  %v5325_v7 = vld [vmem:[%s6783_s1 + $0x428] sm:$0xff]   ;;  %v5356_v49 = vld [vmem:[%s6783_s1 + $0x5a0] sm:$0xff]   ;;  %v5361_v54 = vld [vmem:[%s6783_s1 + $0x570] sm:$0xff]  }
  0x66   :  { %4839 = vmatprep.subr.bf16.mxu1 %v5277_v12  ;;  %v5327_v9 = vld [vmem:[%s6783_s1 + $0x4a8] sm:$0xff]   ;;  %v5330_v12 = vld [vmem:[%s6783_s1 + $0x4f0] sm:$0xff]  }
  0x67   :  { %4818 = vmatpush3.bf16.msra.mxu0 %v5276_v11  ;;  %v5329_v11 = vld [vmem:[%s6783_s1 + $0x430] sm:$0xff]  }
  0x68   :  { %4819 = vmatprep.subr.bf16.mxu0 %v5279_v14  ;;  %v5332_v14 = vld [vmem:[%s6783_s1 + $0x478] sm:$0xff]  }
  0x69   :  { %4840 = vmatpush3.bf16.msra.mxu1 %v5278_v13  ;;  %v5331_v13 = vld [vmem:[%s6783_s1 + $0x4b0] sm:$0xff]  }
  0x6a   :  { %4841 = vmatprep.subr.bf16.mxu1 %v5281_v16  ;;  %v5334_v16 = vld [vmem:[%s6783_s1 + $0x4f8] sm:$0xff]  }
  0x6b   :  { %4820 = vmatpush3.bf16.msra.mxu0 %v5280_v15  ;;  %v5333_v15 = vld [vmem:[%s6783_s1 + $0x438] sm:$0xff]  }
  0x6c   :  { %4821 = vmatprep.subr.bf16.mxu0 %v5283_v18 }
  0x6d   :  { %4842 = vmatpush3.bf16.msra.mxu1 %v5282_v17  ;;  %v30_v17 = vld [vmem:[%s6784_s0 + $0x20] sm:$0xff] }
  0x6e   :  { %4843 = vmatprep.subr.bf16.mxu1 %v5285_v20  ;;  %v123_v18 = vrot.slane %v30_v17, %v5706_v34  ;;  %v116_v20 = vcombine.high %v30_v17, %v30_v17  ;;  %v5379_v17 = vld [vmem:[%s6783_s1 + $0x610] sm:$0xff]  }
  0x6f   :  { %4822 = vmatpush3.bf16.msra.mxu0 %v5284_v19  ;;  %v5335_v19 = vld [vmem:[%s6783_s1 + $0x4b8] sm:$0xff]  }
  0x70   :  { %4823 = vmatprep.subr.bf16.mxu0 %v5287_v22  ;;  %v131_v22 = vcombine.high %v123_v18, %v123_v18 }
  0x71   :  { %4844 = vmatpush3.bf16.msra.mxu1 %v5286_v21  ;;  %v5336_v21 = vld [vmem:[%s6783_s1 + $0x540] sm:$0xff]  }
  0x72   :  { %4845 = vmatprep.subr.bf16.mxu1 %v5289_v24  ;;  %v5338_v24 = vld [vmem:[%s6783_s1 + $0x500] sm:$0xff]  }
  0x73   :  { %4824 = vmatpush3.bf16.msra.mxu0 %v5288_v23  ;;  %v130_v23 = vrot.slane %v116_v20, %v5706_v34  ;;  %v5382_v20 = vld [vmem:[%s6783_s1 + $0x658] sm:$0xff]  }
  0x74   :  { %4825 = vmatprep.subr.bf16.mxu0 %v5291_v26  ;;  %v5339_v26 = vld [vmem:[%s6783_s1 + $0x5c0] sm:$0xff]  }
  0x75   :  { %4846 = vmatpush3.bf16.msra.mxu1 %v5290_v25  ;;  %v293_v25 = vpack.c.bf16 %v123_v18, %v123_v18  ;;  %v5380_v18 = vld [vmem:[%s6783_s1 + $0x6d0] sm:$0xff]  }
  0x76   :  { %4847 = vmatprep.subr.bf16.mxu1 %v5293_v28  ;;  %v132_v28 = vcombine.high %v130_v23, %v130_v23 }
  0x77   :  { %4826 = vmatpush3.bf16.msra.mxu0 %v5292_v27  ;;  %v294_v27 = vpack.c.bf16 %v131_v22, %v131_v22  ;;  %v5384_v22 = vld [vmem:[%s6783_s1 + $0x6d8] sm:$0xff]  }
  0x78   :  { %4827 = vmatprep.subr.bf16.mxu0 %v5295_v31  ;;  %v295_v31 = vpack.c.bf16 %v130_v23, %v130_v23  ;;  %v5385_v23 = vld [vmem:[%s6783_s1 + $0x698] sm:$0xff]  }
  0x79   :  { %4848 = vmatpush3.bf16.msra.mxu1 %v5294_v30  ;;  %v5340_v30 = vld [vmem:[%s6783_s1 + $0x580] sm:$0xff]  }
  0x7a   :  { %4849 = vmatprep.subr.bf16.mxu1 %v5297_v33  ;;  %v296_v33 = vpack.c.bf16 %v132_v28, %v132_v28  ;;  %v5390_v28 = vld [vmem:[%s6783_s1 + $0x668] sm:$0xff]  }
  0x7b   :  { %4828 = vmatpush3.bf16.msra.mxu0 %v5296_v32  ;;  %v5341_v32 = vld [vmem:[%s6783_s1 + $0x548] sm:$0xff]  }
  0x7c   :  { %4829 = vmatprep.subr.bf16.mxu0 %v5299_v36  ;;  %v5343_v36 = vld [vmem:[%s6783_s1 + $0x5c8] sm:$0xff]  }
  0x7d   :  { %4850 = vmatpush3.bf16.msra.mxu1 %v5298_v35  ;;  %v5342_v35 = vld [vmem:[%s6783_s1 + $0x508] sm:$0xff]  }
  0x7e   :  { %4851 = vmatprep.subr.bf16.mxu1 %v5301_v38  ;;  %v5345_v38 = vld [vmem:[%s6783_s1 + $0x550] sm:$0xff]  }
  0x7f   :  { %4830 = vmatpush3.bf16.msra.mxu0 %v5300_v37  ;;  %v5344_v37 = vld [vmem:[%s6783_s1 + $0x588] sm:$0xff]  }
  0x80   :  { %4859 = vmatprep.subr.bf16.mxu0 %v5303_v43  ;;  %v5350_v43 = vld [vmem:[%s6783_s1 + $0x518] sm:$0xff]  }
  0x81   :  { %4852 = vmatpush3.bf16.msra.mxu1 %v5302_v41  ;;  %v5348_v41 = vld [vmem:[%s6783_s1 + $0x590] sm:$0xff]  }
  0x82   :  { %4881 = vmatprep.subr.bf16.mxu1 %v5306_v48  ;;  %3308 = vmatmul.mubr.bf16.vlgmr.msra.gmra.mrb[12].mxu0 %v289_v47  ;;  %v5354_v47 = vld [vmem:[%s6783_s1 + $0x520] sm:$0xff]  }
  0x83   :  { %4860 = vmatpush3.bf16.msra.mxu0 %v5305_v46  ;;  %3387 = vmatprep.mubr.bf16.mxu0 %v294_v27  ;;  %v5353_v46 = vld [vmem:[%s6783_s1 + $0x560] sm:$0xff]  }
  0x84   :  { %3348 = vmatmul.mubr.bf16.vlgmr.msra.gmra.mrb[12].mxu1 %v291_v52  ;;  %4861 = vmatprep.subr.bf16.mxu0 %v5308_v53  ;;  %v5355_v48 = vld [vmem:[%s6783_s1 + $0x5e0] sm:$0xff]   ;;  %v5359_v52 = vld [vmem:[%s6783_s1 + $0x5e8] sm:$0xff]  }
  0x85   :  { %4882 = vmatpush3.bf16.msra.mxu1 %v5307_v51  ;;  %3427 = vmatprep.mubr.bf16.mxu1 %v296_v33  ;;  %v5358_v51 = vld [vmem:[%s6783_s1 + $0x528] sm:$0xff]   ;;  %v5389_v27 = vld [vmem:[%s6783_s1 + $0x6a0] sm:$0xff]   ;;  %v5394_v33 = vld [vmem:[%s6783_s1 + $0x670] sm:$0xff]  }
  0x86   :  { %4883 = vmatprep.subr.bf16.mxu1 %v5310_v56  ;;  %v5360_v53 = vld [vmem:[%s6783_s1 + $0x5a8] sm:$0xff]   ;;  %v5363_v56 = vld [vmem:[%s6783_s1 + $0x5f0] sm:$0xff]  }
  0x87   :  { %4862 = vmatpush3.bf16.msra.mxu0 %v5309_v55  ;;  %v5362_v55 = vld [vmem:[%s6783_s1 + $0x530] sm:$0xff]  }
  0x88   :  { %4863 = vmatprep.subr.bf16.mxu0 %v5312_v58  ;;  %v5365_v58 = vld [vmem:[%s6783_s1 + $0x578] sm:$0xff]  }
  0x89   :  { %4884 = vmatpush3.bf16.msra.mxu1 %v5311_v57  ;;  %v5364_v57 = vld [vmem:[%s6783_s1 + $0x5b0] sm:$0xff]  }
  0x8a   :  { %4885 = vmatprep.subr.bf16.mxu1 %v5314_v60  ;;  %v5367_v60 = vld [vmem:[%s6783_s1 + $0x5f8] sm:$0xff]  }
  0x8b   :  { %4864 = vmatpush3.bf16.msra.mxu0 %v5313_v59  ;;  %v5366_v59 = vld [vmem:[%s6783_s1 + $0x538] sm:$0xff]  }
  0x8c   :  { %4865 = vmatprep.subr.bf16.mxu0 %v5316_v62 }
  0x8d   :  { %4886 = vmatpush3.bf16.msra.mxu1 %v5315_v61  ;;  %v31_v61 = vld [vmem:[%s6784_s0 + $0x28] sm:$0xff] }
  0x8e   :  { %4887 = vmatprep.subr.bf16.mxu1 %v5318_v0  ;;  %v140_v62 = vrot.slane %v31_v61, %v5706_v34  ;;  %v133_v0 = vcombine.high %v31_v61, %v31_v61  ;;  %v5413_v61 = vld [vmem:[%s6783_s1 + $0x7d0] sm:$0xff]  }
  0x8f   :  { %4866 = vmatpush3.bf16.msra.mxu0 %v5317_v63  ;;  %v5368_v63 = vld [vmem:[%s6783_s1 + $0x5b8] sm:$0xff]  }
  0x90   :  { %4867 = vmatprep.subr.bf16.mxu0 %v5320_v2  ;;  %v148_v2 = vcombine.high %v140_v62, %v140_v62 }
  0x91   :  { %4888 = vmatpush3.bf16.msra.mxu1 %v5319_v1  ;;  %v5369_v1 = vld [vmem:[%s6783_s1 + $0x640] sm:$0xff]  }
  0x92   :  { %4889 = vmatprep.subr.bf16.mxu1 %v5322_v4  ;;  %v5371_v4 = vld [vmem:[%s6783_s1 + $0x600] sm:$0xff]  }
  0x93   :  { %4868 = vmatpush3.bf16.msra.mxu0 %v5321_v3  ;;  %v147_v3 = vrot.slane %v133_v0, %v5706_v34  ;;  %v5414_v0 = vld [vmem:[%s6783_s1 + $0x790] sm:$0xff]  }
  0x94   :  { %4869 = vmatprep.subr.bf16.mxu0 %v5324_v6  ;;  %v5372_v6 = vld [vmem:[%s6783_s1 + $0x6c0] sm:$0xff]  }
  0x95   :  { %4890 = vmatpush3.bf16.msra.mxu1 %v5323_v5  ;;  %v297_v5 = vpack.c.bf16 %v140_v62, %v140_v62  ;;  %v5412_v62 = vld [vmem:[%s6783_s1 + $0x710] sm:$0xff]  }
  0x96   :  { %4891 = vmatprep.subr.bf16.mxu1 %v5326_v8  ;;  %v149_v8 = vcombine.high %v147_v3, %v147_v3 }
  0x97   :  { %4870 = vmatpush3.bf16.msra.mxu0 %v5325_v7  ;;  %v298_v7 = vpack.c.bf16 %v148_v2, %v148_v2  ;;  %v5416_v2 = vld [vmem:[%s6783_s1 + $0x718] sm:$0xff]  }
  0x98   :  { %4871 = vmatprep.subr.bf16.mxu0 %v5328_v10  ;;  %v299_v10 = vpack.c.bf16 %v147_v3, %v147_v3  ;;  %v5419_v3 = vld [vmem:[%s6783_s1 + $0x760] sm:$0xff]  }
  0x99   :  { %4892 = vmatpush3.bf16.msra.mxu1 %v5327_v9  ;;  %v5373_v9 = vld [vmem:[%s6783_s1 + $0x680] sm:$0xff]  }
  0x9a   :  { %4893 = vmatprep.subr.bf16.mxu1 %v5330_v12  ;;  %v300_v12 = vpack.c.bf16 %v149_v8, %v149_v8  ;;  %v5423_v8 = vld [vmem:[%s6783_s1 + $0x768] sm:$0xff]  }
  0x9b   :  { %4872 = vmatpush3.bf16.msra.mxu0 %v5329_v11  ;;  %v5374_v11 = vld [vmem:[%s6783_s1 + $0x648] sm:$0xff]  }
  0x9c   :  { %4873 = vmatprep.subr.bf16.mxu0 %v5332_v14  ;;  %v5376_v14 = vld [vmem:[%s6783_s1 + $0x6c8] sm:$0xff]  }
  0x9d   :  { %4894 = vmatpush3.bf16.msra.mxu1 %v5331_v13  ;;  %v5375_v13 = vld [vmem:[%s6783_s1 + $0x608] sm:$0xff]  }
  0x9e   :  { %4895 = vmatprep.subr.bf16.mxu1 %v5334_v16  ;;  %v5378_v16 = vld [vmem:[%s6783_s1 + $0x650] sm:$0xff]  }
  0x9f   :  { %4874 = vmatpush3.bf16.msra.mxu0 %v5333_v15  ;;  %v5377_v15 = vld [vmem:[%s6783_s1 + $0x688] sm:$0xff]  }
  0xa0   :  { %4903 = vmatprep.subr.bf16.mxu0 %v5336_v21  ;;  %v5383_v21 = vld [vmem:[%s6783_s1 + $0x618] sm:$0xff]  }
  0xa1   :  { %4896 = vmatpush3.bf16.msra.mxu1 %v5335_v19  ;;  %v5381_v19 = vld [vmem:[%s6783_s1 + $0x690] sm:$0xff]  }
  0xa2   :  { %3388 = vmatmul.mubr.bf16.vlgmr.msra.gmra.mrb[16].mxu0 %v293_v25  ;;  %4925 = vmatprep.subr.bf16.mxu1 %v5339_v26  ;;  %v5387_v25 = vld [vmem:[%s6783_s1 + $0x620] sm:$0xff]  }
  0xa3   :  { %4904 = vmatpush3.bf16.msra.mxu0 %v5338_v24  ;;  %3467 = vmatprep.mubr.bf16.mxu0 %v298_v7  ;;  %v5386_v24 = vld [vmem:[%s6783_s1 + $0x660] sm:$0xff]  }
  0xa4   :  { %3428 = vmatmul.mubr.bf16.vlgmr.msra.gmra.mrb[16].mxu1 %v295_v31  ;;  %4905 = vmatprep.subr.bf16.mxu0 %v5341_v32  ;;  %v5388_v26 = vld [vmem:[%s6783_s1 + $0x6e0] sm:$0xff]   ;;  %v5392_v31 = vld [vmem:[%s6783_s1 + $0x6e8] sm:$0xff]  }
  0xa5   :  { %4926 = vmatpush3.bf16.msra.mxu1 %v5340_v30  ;;  %3507 = vmatprep.mubr.bf16.mxu1 %v300_v12  ;;  %v5391_v30 = vld [vmem:[%s6783_s1 + $0x628] sm:$0xff]   ;;  %v5422_v7 = vld [vmem:[%s6783_s1 + $0x7a0] sm:$0xff]  }
  0xa6   :  { %4927 = vmatprep.subr.bf16.mxu1 %v5343_v36  ;;  %v5393_v32 = vld [vmem:[%s6783_s1 + $0x6a8] sm:$0xff]   ;;  %v5396_v36 = vld [vmem:[%s6783_s1 + $0x6f0] sm:$0xff]  }
  0xa7   :  { %4906 = vmatpush3.bf16.msra.mxu0 %v5342_v35  ;;  %v5395_v35 = vld [vmem:[%s6783_s1 + $0x630] sm:$0xff]  }
  0xa8   :  { %4907 = vmatprep.subr.bf16.mxu0 %v5345_v38  ;;  %v5398_v38 = vld [vmem:[%s6783_s1 + $0x678] sm:$0xff]  }
  0xa9   :  { %4928 = vmatpush3.bf16.msra.mxu1 %v5344_v37  ;;  %v5397_v37 = vld [vmem:[%s6783_s1 + $0x6b0] sm:$0xff]  }
  0xaa   :  { %4929 = vmatprep.subr.bf16.mxu1 %v5347_v40  ;;  %v5400_v40 = vld [vmem:[%s6783_s1 + $0x6f8] sm:$0xff]  }
  0xab   :  { %4908 = vmatpush3.bf16.msra.mxu0 %v5346_v39  ;;  %v5399_v39 = vld [vmem:[%s6783_s1 + $0x638] sm:$0xff]  }
  0xac   :  { %4909 = vmatprep.subr.bf16.mxu0 %v5349_v42 }
  0xad   :  { %4930 = vmatpush3.bf16.msra.mxu1 %v5348_v41  ;;  %v32_v41 = vld [vmem:[%s6784_s0 + $0x30] sm:$0xff] }
  0xae   :  { %4931 = vmatprep.subr.bf16.mxu1 %v5351_v44  ;;  %v157_v42 = vrot.slane %v32_v41, %v5706_v34  ;;  %v150_v44 = vcombine.high %v32_v41, %v32_v41 }
  0xaf   :  { %4910 = vmatpush3.bf16.msra.mxu0 %v5350_v43  ;;  %v5401_v43 = vld [vmem:[%s6783_s1 + $0x6b8] sm:$0xff]  }
  0xb0   :  { %4911 = vmatprep.subr.bf16.mxu0 %v5353_v46  ;;  %v165_v46 = vcombine.high %v157_v42, %v157_v42 }
  0xb1   :  { %4932 = vmatpush3.bf16.msra.mxu1 %v5352_v45  ;;  %v5402_v45 = vld [vmem:[%s6783_s1 + $0x740] sm:$0xff]  }
  0xb2   :  { %4933 = vmatprep.subr.bf16.mxu1 %v5355_v48  ;;  %v301_v48 = vpack.c.bf16 %v157_v42, %v157_v42  ;;  %v5438_v42 = vld [vmem:[%s6783_s1 + $0x8c0] sm:$0xff]  }
  0xb3   :  { %4912 = vmatpush3.bf16.msra.mxu0 %v5354_v47  ;;  %v164_v47 = vrot.slane %v150_v44, %v5706_v34 }
  0xb4   :  { %4913 = vmatprep.subr.bf16.mxu0 %v5357_v50  ;;  %v302_v50 = vpack.c.bf16 %v165_v46, %v165_v46 }
  0xb5   :  { %4934 = vmatpush3.bf16.msra.mxu1 %v5356_v49  ;;  %v5405_v49 = vld [vmem:[%s6783_s1 + $0x7c0] sm:$0xff]  }
  0xb6   :  { %4935 = vmatprep.subr.bf16.mxu1 %v5359_v52  ;;  %v5404_v52 = vld [vmem:[%s6783_s1 + $0x700] sm:$0xff]  }
  0xb7   :  { %4914 = vmatpush3.bf16.msra.mxu0 %v5358_v51  ;;  %v166_v51 = vcombine.high %v164_v47, %v164_v47 }
  0xb8   :  { %4915 = vmatprep.subr.bf16.mxu0 %v5361_v54  ;;  %v5407_v54 = vld [vmem:[%s6783_s1 + $0x748] sm:$0xff]  }
  0xb9   :  { %4936 = vmatpush3.bf16.msra.mxu1 %v5360_v53  ;;  %v303_v53 = vpack.c.bf16 %v164_v47, %v164_v47  ;;  %v5440_v47 = vld [vmem:[%s6783_s1 + $0x848] sm:$0xff]  }
  0xba   :  { %4937 = vmatprep.subr.bf16.mxu1 %v5363_v56  ;;  %v5406_v56 = vld [vmem:[%s6783_s1 + $0x780] sm:$0xff]  }
  0xbb   :  { %4916 = vmatpush3.bf16.msra.mxu0 %v5362_v55  ;;  %v304_v55 = vpack.c.bf16 %v166_v51, %v166_v51  ;;  %v5441_v51 = vld [vmem:[%s6783_s1 + $0x808] sm:$0xff]  }
  0xbc   :  { %4917 = vmatprep.subr.bf16.mxu0 %v5365_v58  ;;  %v5408_v58 = vld [vmem:[%s6783_s1 + $0x708] sm:$0xff]  }
  0xbd   :  { %4938 = vmatpush3.bf16.msra.mxu1 %v5364_v57  ;;  %v5409_v57 = vld [vmem:[%s6783_s1 + $0x7c8] sm:$0xff]  }
  0xbe   :  { %4939 = vmatprep.subr.bf16.mxu1 %v5367_v60  ;;  %v5410_v60 = vld [vmem:[%s6783_s1 + $0x788] sm:$0xff]  }
  0xbf   :  { %4918 = vmatpush3.bf16.msra.mxu0 %v5366_v59  ;;  %v5411_v59 = vld [vmem:[%s6783_s1 + $0x750] sm:$0xff]  }
  0xc0   :  { %4947 = vmatprep.subr.bf16.mxu0 %v5369_v1  ;;  %v5417_v1 = vld [vmem:[%s6783_s1 + $0x7d8] sm:$0xff]  }
  0xc1   :  { %4940 = vmatpush3.bf16.msra.mxu1 %v5368_v63  ;;  %v5415_v63 = vld [vmem:[%s6783_s1 + $0x758] sm:$0xff]  }
  0xc2   :  { %3468 = vmatmul.mubr.bf16.vlgmr.msra.gmra.mrb[20].mxu0 %v297_v5  ;;  %4969 = vmatprep.subr.bf16.mxu1 %v5372_v6  ;;  %v5421_v5 = vld [vmem:[%s6783_s1 + $0x7e0] sm:$0xff]  }
  0xc3   :  { %4948 = vmatpush3.bf16.msra.mxu0 %v5371_v4  ;;  %3547 = vmatprep.mubr.bf16.mxu0 %v302_v50  ;;  %v5418_v4 = vld [vmem:[%s6783_s1 + $0x798] sm:$0xff]   ;;  %v5420_v6 = vld [vmem:[%s6783_s1 + $0x720] sm:$0xff]   ;;  %v5442_v50 = vld [vmem:[%s6783_s1 + $0x8c8] sm:$0xff]  }
  0xc4   :  { %3508 = vmatmul.mubr.bf16.vlgmr.msra.gmra.mrb[20].mxu1 %v299_v10  ;;  %4949 = vmatprep.subr.bf16.mxu0 %v5374_v11  ;;  %v4318_v10 = vld [vmem:[%s6785_s2] ss:$0 sm:$0xff]  ;;  %v5425_v11 = vld [vmem:[%s6783_s1 + $0x7e8] sm:$0xff]  }
  0xc5   :  { %4970 = vmatpush3.bf16.msra.mxu1 %v5373_v9  ;;  %3587 = vmatprep.mubr.bf16.mxu1 %v304_v55  ;;  %v5424_v9 = vld [vmem:[%s6783_s1 + $0x728] sm:$0xff]   ;;  %v5445_v55 = vld [vmem:[%s6783_s1 + $0x810] sm:$0xff]  }
  0xc6   :  { %4971 = vmatprep.subr.bf16.mxu1 %v5376_v14 }
  0xc7   :  { %4950 = vmatpush3.bf16.msra.mxu0 %v5375_v13  ;;  %v5426_v13 = vld [vmem:[%s6783_s1 + $0x7a8] sm:$0xff]  }
  0xc8   :  { %4951 = vmatprep.subr.bf16.mxu0 %v5378_v16 }
  0xc9   :  { %4972 = vmatpush3.bf16.msra.mxu1 %v5377_v15  ;;  %v5427_v15 = vld [vmem:[%s6783_s1 + $0x770] sm:$0xff]  }
  0xca   :  { %4973 = vmatprep.subr.bf16.mxu1 %v5380_v18 }
  0xcb   :  { %4952 = vmatpush3.bf16.msra.mxu0 %v5379_v17 }
  0xcc   :  { %4953 = vmatprep.subr.bf16.mxu0 %v5382_v20  ;;  %v5429_v20 = vld [vmem:[%s6783_s1 + $0x7f0] sm:$0xff]  }
  0xcd   :  { %4974 = vmatpush3.bf16.msra.mxu1 %v5381_v19  ;;  %v5428_v19 = vld [vmem:[%s6783_s1 + $0x730] sm:$0xff]  }
  0xce   :  { %4975 = vmatprep.subr.bf16.mxu1 %v5384_v22 }
  0xcf   :  { %4954 = vmatpush3.bf16.msra.mxu0 %v5383_v21 }
  0xd0   :  { %4955 = vmatprep.subr.bf16.mxu0 %v5386_v24 }
  0xd1   :  { %4976 = vmatpush3.bf16.msra.mxu1 %v5385_v23 }
  0xd2   :  { %4977 = vmatprep.subr.bf16.mxu1 %v5388_v26 }
  0xd3   :  { %4956 = vmatpush3.bf16.msra.mxu0 %v5387_v25  ;;  %v5430_v25 = vld [vmem:[%s6783_s1 + $0x7b0] sm:$0xff]  }
  0xd4   :  { %4957 = vmatprep.subr.bf16.mxu0 %v5390_v28 }
  0xd5   :  { %4978 = vmatpush3.bf16.msra.mxu1 %v5389_v27  ;;  %v5431_v27 = vld [vmem:[%s6783_s1 + $0x778] sm:$0xff]  }
  0xd6   :  { %4979 = vmatprep.subr.bf16.mxu1 %v5392_v31  ;;  %v5432_v31 = vld [vmem:[%s6783_s1 + $0x738] sm:$0xff]  }
  0xd7   :  { %4958 = vmatpush3.bf16.msra.mxu0 %v5391_v30 }
  0xd8   :  { %4959 = vmatprep.subr.bf16.mxu0 %v5394_v33  ;;  %v33_v33 = vld [vmem:[%s6784_s0 + $0x38] sm:$0xff] }
  0xd9   :  { %4980 = vmatpush3.bf16.msra.mxu1 %v5393_v32  ;;  %v5433_v32 = vld [vmem:[%s6783_s1 + $0x7f8] sm:$0xff]  }
  0xda   :  { %4981 = vmatprep.subr.bf16.mxu1 %v5396_v36  ;;  %v5434_v36 = vld [vmem:[%s6783_s1 + $0x7b8] sm:$0xff]  }
  0xdb   :  { %4960 = vmatpush3.bf16.msra.mxu0 %v5395_v35  ;;  %v174_v35 = vrot.slane %v33_v33, %v5706_v34 }
  0xdc   :  { %4961 = vmatprep.subr.bf16.mxu0 %v5398_v38  ;;  %v5435_v38 = vld [vmem:[%s6783_s1 + $0x840] sm:$0xff]  }
  0xdd   :  { %4982 = vmatpush3.bf16.msra.mxu1 %v5397_v37  ;;  %v167_v37 = vcombine.high %v33_v33, %v33_v33  ;;  %v305_v41 = vpack.c.bf16 %v174_v35, %v174_v35 }
  0xde   :  { %4983 = vmatprep.subr.bf16.mxu1 %v5400_v40 }
  0xdf   :  { %4962 = vmatpush3.bf16.msra.mxu0 %v5399_v39  ;;  %v182_v39 = vcombine.high %v174_v35, %v174_v35  ;;  %v181_v40 = vrot.slane %v167_v37, %v5706_v34  ;;  %v5471_v35 = vld [vmem:[%s6783_s1 + $0x9c0] sm:$0xff]  }
  0xe0   :  { %4991 = vmatprep.subr.bf16.mxu0 %v5402_v45  ;;  %v5437_v45 = vld [vmem:[%s6783_s1 + $0x800] sm:$0xff]  }
  0xe1   :  { %4984 = vmatpush3.bf16.msra.mxu1 %v5401_v43  ;;  %v306_v43 = vpack.c.bf16 %v182_v39, %v182_v39  ;;  %v183_v44 = vcombine.high %v181_v40, %v181_v40  ;;  %v307_v46 = vpack.c.bf16 %v181_v40, %v181_v40  ;;  %v5473_v40 = vld [vmem:[%s6783_s1 + $0x948] sm:$0xff]  }
  0xe2   :  { %5013 = vmatprep.subr.bf16.mxu1 %v5405_v49  ;;  %3548 = vmatmul.mubr.bf16.vlgmr.msra.gmra.mrb[24].mxu0 %v301_v48  ;;  %v5439_v49 = vld [vmem:[%s6783_s1 + $0x880] sm:$0xff]  }
  0xe3   :  { %4992 = vmatpush3.bf16.msra.mxu0 %v5404_v52  ;;  %3627 = vmatprep.mubr.bf16.mxu0 %v306_v43  ;;  %v308_v48 = vpack.c.bf16 %v183_v44, %v183_v44  ;;  %v5444_v52 = vld [vmem:[%s6783_s1 + $0x850] sm:$0xff]   ;;  %v5475_v43 = vld [vmem:[%s6783_s1 + $0x9c8] sm:$0xff]  }
  0xe4   :  { %3588 = vmatmul.mubr.bf16.vlgmr.msra.gmra.mrb[24].mxu1 %v303_v53  ;;  %4993 = vmatprep.subr.bf16.mxu0 %v5407_v54  ;;  %v5443_v53 = vld [vmem:[%s6783_s1 + $0x888] sm:$0xff]   ;;  %v5446_v54 = vld [vmem:[%s6783_s1 + $0x8d0] sm:$0xff]  }
  0xe5   :  { %5014 = vmatpush3.bf16.msra.mxu1 %v5406_v56  ;;  %3667 = vmatprep.mubr.bf16.mxu1 %v308_v48  ;;  %v5448_v56 = vld [vmem:[%s6783_s1 + $0x858] sm:$0xff]   ;;  %v5476_v44 = vld [vmem:[%s6783_s1 + $0x988] sm:$0xff]   ;;  %v5480_v48 = vld [vmem:[%s6783_s1 + $0x990] sm:$0xff]  }
  0xe6   :  { %5015 = vmatprep.subr.bf16.mxu1 %v5409_v57  ;;  %v5447_v57 = vld [vmem:[%s6783_s1 + $0x890] sm:$0xff]  }
  0xe7   :  { %4994 = vmatpush3.bf16.msra.mxu0 %v5408_v58  ;;  %v5450_v58 = vld [vmem:[%s6783_s1 + $0x8d8] sm:$0xff]  }
  0xe8   :  { %4995 = vmatprep.subr.bf16.mxu0 %v5411_v59  ;;  %v5449_v59 = vld [vmem:[%s6783_s1 + $0x818] sm:$0xff]  }
  0xe9   :  { %5016 = vmatpush3.bf16.msra.mxu1 %v5410_v60  ;;  %v5452_v60 = vld [vmem:[%s6783_s1 + $0x860] sm:$0xff]  }
  0xea   :  { %5017 = vmatprep.subr.bf16.mxu1 %v5413_v61  ;;  %v5451_v61 = vld [vmem:[%s6783_s1 + $0x898] sm:$0xff]  }
  0xeb   :  { %4996 = vmatpush3.bf16.msra.mxu0 %v5412_v62  ;;  %v5454_v62 = vld [vmem:[%s6783_s1 + $0x8e0] sm:$0xff]  }
  0xec   :  { %4997 = vmatprep.subr.bf16.mxu0 %v5415_v63  ;;  %v5453_v63 = vld [vmem:[%s6783_s1 + $0x820] sm:$0xff]  }
  0xed   :  { %5018 = vmatpush3.bf16.msra.mxu1 %v5414_v0  ;;  %v5456_v0 = vld [vmem:[%s6783_s1 + $0x868] sm:$0xff]  }
  0xee   :  { %5019 = vmatprep.subr.bf16.mxu1 %v5417_v1  ;;  %v5455_v1 = vld [vmem:[%s6783_s1 + $0x8a0] sm:$0xff]  }
  0xef   :  { %4998 = vmatpush3.bf16.msra.mxu0 %v5416_v2 }
  0xf0   :  { %4999 = vmatprep.subr.bf16.mxu0 %v5419_v3  ;;  %v5458_v3 = vld [vmem:[%s6783_s1 + $0x8e8] sm:$0xff]  }
  0xf1   :  { %5020 = vmatpush3.bf16.msra.mxu1 %v5418_v4 }
  0xf2   :  { %5021 = vmatprep.subr.bf16.mxu1 %v5421_v5  ;;  %v5457_v5 = vld [vmem:[%s6783_s1 + $0x828] sm:$0xff]  }
  0xf3   :  { %5000 = vmatpush3.bf16.msra.mxu0 %v5420_v6 }
  0xf4   :  { %5001 = vmatprep.subr.bf16.mxu0 %v5423_v8 }
  0xf5   :  { %v4699_v12 = vpop.f32.mrb[0].mxu0  ;;  %5022 = vmatpush3.bf16.msra.mxu1 %v5422_v7 }
  0xf6   :  { %v4700_v14 = vpop.f32.mrb[1].mxu0  ;;  %5023 = vmatprep.subr.bf16.mxu1 %v5425_v11 }
  0xf7   :  { %v4701_v16 = vadd.f32 %v4700_v14, %v4699_v12  ;;  %v4702_v17 = vpop.f32.mrb[2].mxu0  ;;  %v4721_v18 = vpop.f32.mrb[0].mxu1  ;;  %5002 = vmatpush3.bf16.msra.mxu0 %v5424_v9  ;;  %v5459_v9 = vld [vmem:[%s6783_s1 + $0x8a8] sm:$0xff]  }
  0xf8   :  { %v4703_v21 = vpop.f32.mrb[3].mxu0  ;;  %v4722_v22 = vpop.f32.mrb[1].mxu1  ;;  %5003 = vmatprep.subr.bf16.mxu0 %v5427_v15 }
  0xf9   :  { %v3070_v23 = vadd.f32 %v4701_v16, %v4318_v10  ;;  %v4723_v24 = vadd.f32 %v4722_v22, %v4721_v18  ;;  %v4724_v26 = vpop.f32.mrb[2].mxu1  ;;  %5024 = vmatpush3.bf16.msra.mxu1 %v5426_v13  ;;  %v5460_v10 = vld [vmem:[%s6783_s1 + $0x870] sm:$0xff]   ;;  %v5464_v21 = vld [vmem:[%s6783_s1 + $0x878] sm:$0xff]  }
  0xfa   :  { %v4725_v28 = vpop.f32.mrb[3].mxu1  ;;  %5025 = vmatprep.subr.bf16.mxu1 %v5429_v20  ;;  %v5461_v13 = vld [vmem:[%s6783_s1 + $0x830] sm:$0xff]   ;;  %v5465_v22 = vld [vmem:[%s6783_s1 + $0x838] sm:$0xff]  }
  0xfb   :  { %v6418_v30 = vadd.f32 %v4723_v24, %v3070_v23  ;;  %5004 = vmatpush3.bf16.msra.mxu0 %v5428_v19  ;;  %v5462_v16 = vld [vmem:[%s6783_s1 + $0x8f0] sm:$0xff]   ;;  %v5466_v23 = vld [vmem:[%s6783_s1 + $0x8f8] sm:$0xff]   ;;  %v34_v24 = vld [vmem:[%s6784_s0 + $0x40] sm:$0xff] }
  0xfc   :  { %5005 = vmatprep.subr.bf16.mxu0 %v5431_v27  ;;  %v5463_v18 = vld [vmem:[%s6783_s1 + $0x8b0] sm:$0xff]   ;;  %v5467_v26 = vld [vmem:[%s6783_s1 + $0x8b8] sm:$0xff]   ;;  %v184_v27 = vcombine.high %v34_v24, %v34_v24  ;;  %v5468_v28 = vld [vmem:[%s6783_s1 + $0x940] sm:$0xff]  }
  0xfd   :  { %5026 = vmatpush3.bf16.msra.mxu1 %v5430_v25  ;;  %v191_v25 = vrot.slane %v34_v24, %v5706_v34 }
  0xfe   :  { %5027 = vmatprep.subr.bf16.mxu1 %v5433_v32  ;;  %v5470_v32 = vld [vmem:[%s6783_s1 + $0x900] sm:$0xff]  }
  0xff   :  { %5006 = vmatpush3.bf16.msra.mxu0 %v5432_v31  ;;  %v198_v31 = vrot.slane %v184_v27, %v5706_v34  ;;  %v309_v33 = vpack.c.bf16 %v191_v25, %v191_v25 }
 0x100   :  { %5035 = vmatprep.subr.bf16.mxu0 %v5435_v38  ;;  %v5472_v38 = vld [vmem:[%s6783_s1 + $0x980] sm:$0xff]  }
 0x101   :  { %5028 = vmatpush3.bf16.msra.mxu1 %v5434_v36  ;;  %v200_v37 = vcombine.high %v198_v31, %v198_v31  ;;  %v311_v39 = vpack.c.bf16 %v198_v31, %v198_v31  ;;  %v5572_v31 = vmov 0.0  }
 0x102   :  { %5057 = vmatprep.subr.bf16.mxu1 %v5438_v42  ;;  %3628 = vmatmul.mubr.bf16.vlgmr.msra.gmra.mrb[28].mxu0 %v305_v41  ;;  %v5474_v42 = vld [vmem:[%s6783_s1 + $0x908] sm:$0xff]  }
 0x103   :  { %5036 = vmatpush3.bf16.msra.mxu0 %v5437_v45  ;;  %v312_v41 = vpack.c.bf16 %v200_v37, %v200_v37  ;;  %v5477_v45 = vld [vmem:[%s6783_s1 + $0x950] sm:$0xff]   ;;  %v5516_v37 = vld [vmem:[%s6783_s1 + $0xa80] sm:$0xff]  }
 0x104   :  { %3668 = vmatmul.mubr.bf16.vlgmr.msra.gmra.mrb[28].mxu1 %v307_v46  ;;  %5037 = vmatprep.subr.bf16.mxu0 %v5440_v47  ;;  %v5478_v46 = vld [vmem:[%s6783_s1 + $0x910] sm:$0xff]  }
 0x105   :  { %5058 = vmatpush3.bf16.msra.mxu1 %v5439_v49  ;;  %3747 = vmatprep.mubr.bf16.mxu1 %v312_v41  ;;  %v5479_v47 = vld [vmem:[%s6783_s1 + $0x9d0] sm:$0xff]   ;;  %v5481_v49 = vld [vmem:[%s6783_s1 + $0x958] sm:$0xff]  }
 0x106   :  { %5059 = vmatprep.subr.bf16.mxu1 %v5442_v50  ;;  %v5482_v50 = vld [vmem:[%s6783_s1 + $0x918] sm:$0xff]  }
 0x107   :  { %5038 = vmatpush3.bf16.msra.mxu0 %v5441_v51  ;;  %v5483_v51 = vld [vmem:[%s6783_s1 + $0x9d8] sm:$0xff]  }
 0x108   :  { %5039 = vmatprep.subr.bf16.mxu0 %v5444_v52  ;;  %v5484_v52 = vld [vmem:[%s6783_s1 + $0x998] sm:$0xff]  }
 0x109   :  { %5060 = vmatpush3.bf16.msra.mxu1 %v5443_v53  ;;  %v5485_v53 = vld [vmem:[%s6783_s1 + $0x960] sm:$0xff]  }
 0x10a   :  { %5061 = vmatprep.subr.bf16.mxu1 %v5446_v54  ;;  %v5486_v54 = vld [vmem:[%s6783_s1 + $0x920] sm:$0xff]  }
 0x10b   :  { %5040 = vmatpush3.bf16.msra.mxu0 %v5445_v55  ;;  %v5487_v55 = vld [vmem:[%s6783_s1 + $0x9e0] sm:$0xff]  }
 0x10c   :  { %5041 = vmatprep.subr.bf16.mxu0 %v5448_v56  ;;  %v5488_v56 = vld [vmem:[%s6783_s1 + $0x9a0] sm:$0xff]  }
 0x10d   :  { %5062 = vmatpush3.bf16.msra.mxu1 %v5447_v57  ;;  %v5489_v57 = vld [vmem:[%s6783_s1 + $0x968] sm:$0xff]  }
 0x10e   :  { %5063 = vmatprep.subr.bf16.mxu1 %v5450_v58  ;;  %v5490_v58 = vld [vmem:[%s6783_s1 + $0x928] sm:$0xff]  }
 0x10f   :  { %5042 = vmatpush3.bf16.msra.mxu0 %v5449_v59 }
 0x110   :  { %5043 = vmatprep.subr.bf16.mxu0 %v5452_v60  ;;  %v5491_v60 = vld [vmem:[%s6783_s1 + $0x9e8] sm:$0xff]  }
 0x111   :  { %5064 = vmatpush3.bf16.msra.mxu1 %v5451_v61 }
 0x112   :  { %5065 = vmatprep.subr.bf16.mxu1 %v5454_v62  ;;  %v5492_v62 = vld [vmem:[%s6783_s1 + $0x9a8] sm:$0xff]  }
 0x113   :  { %5044 = vmatpush3.bf16.msra.mxu0 %v5453_v63 }
 0x114   :  { %5045 = vmatprep.subr.bf16.mxu0 %v5456_v0 }
 0x115   :  { %v4743_v2 = vpop.f32.mrb[4].mxu0  ;;  %5066 = vmatpush3.bf16.msra.mxu1 %v5455_v1 }
 0x116   :  { %v4744_v4 = vpop.f32.mrb[5].mxu0  ;;  %5067 = vmatprep.subr.bf16.mxu1 %v5458_v3 }
 0x117   :  { %v4745_v6 = vadd.f32 %v4744_v4, %v4743_v2  ;;  %v4746_v7 = vpop.f32.mrb[6].mxu0  ;;  %v4765_v8 = vpop.f32.mrb[4].mxu1  ;;  %5046 = vmatpush3.bf16.msra.mxu0 %v5457_v5  ;;  %v5493_v4 = vld [vmem:[%s6783_s1 + $0x970] sm:$0xff]  }
 0x118   :  { %v4747_v11 = vpop.f32.mrb[7].mxu0  ;;  %v4766_v12 = vpop.f32.mrb[5].mxu1  ;;  %5047 = vmatprep.subr.bf16.mxu0 %v5460_v10  ;;  %v5494_v5 = vld [vmem:[%s6783_s1 + $0x930] sm:$0xff]  }
 0x119   :  { %v3150_v14 = vadd.f32 %v4745_v6, %v6418_v30  ;;  %v4767_v15 = vadd.f32 %v4766_v12, %v4765_v8  ;;  %v4768_v17 = vpop.f32.mrb[6].mxu1  ;;  %5068 = vmatpush3.bf16.msra.mxu1 %v5459_v9  ;;  %v199_v30 = vcombine.high %v191_v25, %v191_v25  ;;  %v5495_v8 = vld [vmem:[%s6783_s1 + $0x9f0] sm:$0xff]  }
 0x11a   :  { %v4769_v19 = vpop.f32.mrb[7].mxu1  ;;  %5069 = vmatprep.subr.bf16.mxu1 %v5462_v16  ;;  %v5496_v11 = vld [vmem:[%s6783_s1 + $0x9b0] sm:$0xff]   ;;  %v35_v16 = vld [vmem:[%s6784_s0 + $0x48] sm:$0xff] }
 0x11b   :  { %v6519_v20 = vadd.f32 %v4767_v15, %v3150_v14  ;;  %5048 = vmatpush3.bf16.msra.mxu0 %v5461_v13  ;;  %v310_v36 = vpack.c.bf16 %v199_v30, %v199_v30  ;;  %v5497_v13 = vld [vmem:[%s6783_s1 + $0x978] sm:$0xff]   ;;  %v208_v17 = vrot.slane %v35_v16, %v5706_v34  ;;  %v201_v19 = vcombine.high %v35_v16, %v35_v16 }
 0x11c   :  { %5049 = vmatprep.subr.bf16.mxu0 %v5464_v21  ;;  %v5498_v14 = vld [vmem:[%s6783_s1 + $0x938] sm:$0xff]  }
 0x11d   :  { %5070 = vmatpush3.bf16.msra.mxu1 %v5463_v18  ;;  %3707 = vmatprep.mubr.bf16.mxu0 %v310_v36  ;;  %v5499_v15 = vld [vmem:[%s6783_s1 + $0x9f8] sm:$0xff]   ;;  %v216_v21 = vcombine.high %v208_v17, %v208_v17 }
 0x11e   :  { %5071 = vmatprep.subr.bf16.mxu1 %v5466_v23  ;;  %v5500_v18 = vld [vmem:[%s6783_s1 + $0x9b8] sm:$0xff]   ;;  %v313_v23 = vpack.c.bf16 %v208_v17, %v208_v17 }
 0x11f   :  { %5050 = vmatpush3.bf16.msra.mxu0 %v5465_v22  ;;  %v215_v22 = vrot.slane %v201_v19, %v5706_v34  ;;  %v314_v24 = vpack.c.bf16 %v216_v21, %v216_v21  ;;  %v5508_v36 = vld [vmem:[%s6783_s1 + $0xa58] sm:$0xff]  }
 0x120   :  { %5079 = vmatprep.subr.bf16.mxu0 %v5468_v28  ;;  %v5504_v28 = vld [vmem:[%s6783_s1 + $0xa48] sm:$0xff]  }
 0x121   :  { %5072 = vmatpush3.bf16.msra.mxu1 %v5467_v26  ;;  %v217_v25 = vcombine.high %v215_v22, %v215_v22  ;;  %v5503_v26 = vld [vmem:[%s6783_s1 + $0xa00] sm:$0xff]   ;;  %v315_v27 = vpack.c.bf16 %v215_v22, %v215_v22 }
 0x122   :  { %3708 = vmatmul.mubr.bf16.vlgmr.msra.gmra.mrb[32].mxu0 %v309_v33  ;;  %5101 = vmatprep.subr.bf16.mxu1 %v5471_v35  ;;  %v5506_v33 = vld [vmem:[%s6783_s1 + $0xa50] sm:$0xff]  }
 0x123   :  { %5080 = vmatpush3.bf16.msra.mxu0 %v5470_v32  ;;  %3787 = vmatprep.mubr.bf16.mxu0 %v314_v24  ;;  %v316_v30 = vpack.c.bf16 %v217_v25, %v217_v25  ;;  %v5505_v32 = vld [vmem:[%s6783_s1 + $0xa08] sm:$0xff]   ;;  %v5507_v35 = vld [vmem:[%s6783_s1 + $0xa10] sm:$0xff]  }
 0x124   :  { %3748 = vmatmul.mubr.bf16.vlgmr.msra.gmra.mrb[32].mxu1 %v311_v39  ;;  %5081 = vmatprep.subr.bf16.mxu0 %v5473_v40  ;;  %v5510_v39 = vld [vmem:[%s6783_s1 + $0xa60] sm:$0xff]   ;;  %v36_v40 = vld [vmem:[%s6784_s0 + $0x50] sm:$0x3f]  ;;  %s5575_s0 = smov 96  }
 0x125   :  { %5102 = vmatpush3.bf16.msra.mxu1 %v5472_v38  ;;  %3827 = vmatprep.mubr.bf16.mxu1 %v316_v30  ;;  %v5509_v38 = vld [vmem:[%s6783_s1 + $0xa18] sm:$0xff]   ;;  %v218_v41 = vcombine.high %v36_v40, %v36_v40 }
 0x126   :  { %5103 = vmatprep.subr.bf16.mxu1 %v5475_v43  ;;  %v5520_v43 = vld [vmem:[%s6783_s1 + $0xa88] sm:$0xff]  }
 0x127   :  { %5082 = vmatpush3.bf16.msra.mxu0 %v5474_v42  ;;  %v225_v42 = vrot.slane %v36_v40, %v5706_v34 }
 0x128   :  { %5083 = vmatprep.subr.bf16.mxu0 %v5477_v45  ;;  %v232_v45 = vrot.slane %v218_v41, %v5706_v34 }
 0x129   :  { %5104 = vmatpush3.bf16.msra.mxu1 %v5476_v44  ;;  %v5511_v44 = vld [vmem:[%s6783_s1 + $0xa20] sm:$0xff]  }
 0x12a   :  { %5105 = vmatprep.subr.bf16.mxu1 %v5479_v47  ;;  %v5512_v47 = vld [vmem:[%s6783_s1 + $0xa68] sm:$0xff]  }
 0x12b   :  { %5084 = vmatpush3.bf16.msra.mxu0 %v5478_v46  ;;  %v233_v46 = vcombine.high %v225_v42, %v225_v42 }
 0x12c   :  { %5085 = vmatprep.subr.bf16.mxu0 %v5481_v49  ;;  %v319_v49 = vpack.c.bf16 %v232_v45, %v232_v45 }
 0x12d   :  { %5106 = vmatpush3.bf16.msra.mxu1 %v5480_v48  ;;  %v318_v48 = vpack.c.bf16 %v233_v46, %v233_v46 }
 0x12e   :  { %5107 = vmatprep.subr.bf16.mxu1 %v5483_v51 }
 0x12f   :  { %5086 = vmatpush3.bf16.msra.mxu0 %v5482_v50 }
 0x130   :  { %5087 = vmatprep.subr.bf16.mxu0 %v5485_v53 }
 0x131   :  { %5108 = vmatpush3.bf16.msra.mxu1 %v5484_v52  ;;  %v5513_v52 = vld [vmem:[%s6783_s1 + $0xa28] sm:$0xff]  }
 0x132   :  { %5109 = vmatprep.subr.bf16.mxu1 %v5487_v55 }
 0x133   :  { %5088 = vmatpush3.bf16.msra.mxu0 %v5486_v54 }
 0x134   :  { %5089 = vmatprep.subr.bf16.mxu0 %v5489_v57 }
 0x135   :  { %v4787_v59 = vpop.f32.mrb[8].mxu0  ;;  %5110 = vmatpush3.bf16.msra.mxu1 %v5488_v56  ;;  %v5514_v56 = vld [vmem:[%s6783_s1 + $0xa70] sm:$0xff]  }
 0x136   :  { %v4788_v61 = vpop.f32.mrb[9].mxu0  ;;  %5111 = vmatprep.subr.bf16.mxu1 %v5491_v60 }
 0x137   :  { %v4789_v63 = vadd.f32 %v4788_v61, %v4787_v59  ;;  %v4790_v0 = vpop.f32.mrb[10].mxu0  ;;  %v4809_v1 = vpop.f32.mrb[8].mxu1  ;;  %5090 = vmatpush3.bf16.msra.mxu0 %v5490_v58 }
 0x138   :  { %v4791_v2 = vpop.f32.mrb[11].mxu0  ;;  %v4810_v3 = vpop.f32.mrb[9].mxu1  ;;  %5091 = vmatprep.subr.bf16.mxu0 %v5493_v4 }
 0x139   :  { %v3230_v6 = vadd.f32 %v4789_v63, %v6519_v20  ;;  %v4811_v7 = vadd.f32 %v4810_v3, %v4809_v1  ;;  %v4812_v9 = vpop.f32.mrb[10].mxu1  ;;  %5112 = vmatpush3.bf16.msra.mxu1 %v5492_v62  ;;  %v5501_v20 = vld [vmem:[%s6783_s1 + $0xa40] sm:$0xff]   ;;  %v5515_v62 = vld [vmem:[%s6783_s1 + $0xa30] sm:$0xff]   ;;  %v5517_v1 = vld [vmem:[%s6783_s1 + $0xa78] sm:$0xff]   ;;  %v317_v3 = vpack.c.bf16 %v225_v42, %v225_v42 }
 0x13a   :  { %v4813_v12 = vpop.f32.mrb[11].mxu1  ;;  %5113 = vmatprep.subr.bf16.mxu1 %v5495_v8  ;;  %v5518_v2 = vld [vmem:[%s6783_s1 + $0xa38] sm:$0xff]  }
 0x13b   :  { %v6620_v10 = vadd.f32 %v4811_v7, %v3230_v6  ;;  %5092 = vmatpush3.bf16.msra.mxu0 %v5494_v5 }
 0x13c   :  { %5093 = vmatprep.subr.bf16.mxu0 %v5497_v13 }
 0x13d   :  { %5114 = vmatpush3.bf16.msra.mxu1 %v5496_v11 }
 0x13e   :  { %5115 = vmatprep.subr.bf16.mxu1 %v5499_v15 }
 0x13f   :  { %5094 = vmatpush3.bf16.msra.mxu0 %v5498_v14 }
 0x140   :  { %5123 = vmatprep.subr.bf16.mxu0 %v5501_v20 }
 0x141   :  { %5116 = vmatpush3.bf16.msra.mxu1 %v5500_v18 }
 0x142   :  { %5151 = vmatprep.subr.bf16.mxu1 %v5572_v31  ;;  %3788 = vmatmul.mubr.bf16.vlgmr.msra.gmra.mrb[36].mxu0 %v313_v23 }
 0x143   :  { %5124 = vmatpush3.bf16.msra.mxu0 %v5503_v26  ;;  %3867 = vmatprep.mubr.bf16.mxu0 %v318_v48 }
 0x144   :  { %3828 = vmatmul.mubr.bf16.vlgmr.msra.gmra.mrb[36].mxu1 %v315_v27  ;;  %5125 = vmatprep.subr.bf16.mxu0 %v5504_v28 }
 0x145   :  { %5155 = vmatprep.mubr.msk.bf16.mxu1 %vm5573_vm0, %v5572_v31  ;;  %5152 = vmatpush3.bf16.msra.mxu1 %v5516_v37 }
 0x146   :  { %5153 = vmatprep.subr.bf16.mxu1 %v5572_v31 }
 0x147   :  { %5126 = vmatpush3.bf16.msra.mxu0 %v5505_v32 }
 0x148   :  { %5127 = vmatprep.subr.bf16.mxu0 %v5506_v33 }
 0x149   :  { %5154 = vmatpush3.bf16.msra.mxu1 %v5520_v43  ;;  %v5521_v43 = vld [vmem:[%s6786_s4] ss:$28 sps:$4 sm:$0xff]  }
 0x14b   :  { %5128 = vmatpush3.bf16.msra.mxu0 %v5507_v35 }
 0x14c   :  { %5129 = vmatprep.subr.bf16.mxu0 %v5508_v36  ;;  %5156 = vmatmul.mubr.msk.bf16.vlgmr.msra.gmra.mrb[40].mxu1 %vm3031_vm1, %v319_v49 }
 0x14f   :  { %5130 = vmatpush3.bf16.msra.mxu0 %v5509_v38 }
 0x150   :  { %5131 = vmatprep.subr.bf16.mxu0 %v5510_v39 }
 0x153   :  { %5132 = vmatpush3.bf16.msra.mxu0 %v5511_v44  ;;  %v5523_v44 = vld [vmem:[%s6786_s4 + $0x4] ss:$28 sps:$4 sm:$0xff]  }
 0x154   :  { %5133 = vmatprep.subr.bf16.mxu0 %v5512_v47  ;;  %4056 = vmatprep.subr.bf16.mxu1 %v5523_v44 }
 0x155   :  { %v4831_v50 = vpop.f32.mrb[12].mxu0  ;;  %4057 = vmatpush1.bf16.msra.mxu1 %v5521_v43  ;;  %v5529_v43 = vld [vmem:[%s6786_s4 + $0x8] ss:$28 sps:$4 sm:$0xff]  }
 0x156   :  { %v4832_v51 = vpop.f32.mrb[13].mxu0 }
 0x157   :  { %v4833_v53 = vadd.f32 %v4832_v51, %v4831_v50  ;;  %v4834_v54 = vpop.f32.mrb[14].mxu0  ;;  %v4853_v55 = vpop.f32.mrb[12].mxu1  ;;  %5134 = vmatpush3.bf16.msra.mxu0 %v5513_v52 }
 0x158   :  { %v4835_v57 = vpop.f32.mrb[15].mxu0  ;;  %v4854_v58 = vpop.f32.mrb[13].mxu1  ;;  %5135 = vmatprep.subr.bf16.mxu0 %v5514_v56 }
 0x159   :  { %v3310_v59 = vadd.f32 %v4833_v53, %v6620_v10  ;;  %v4855_v60 = vadd.f32 %v4854_v58, %v4853_v55  ;;  %v4856_v61 = vpop.f32.mrb[14].mxu1 }
 0x15a   :  { %v4857_v63 = vpop.f32.mrb[15].mxu1 }
 0x15b   :  { %v3350_v0 = vadd.f32 %v4855_v60, %v3310_v59  ;;  %5136 = vmatpush3.bf16.msra.mxu0 %v5515_v62 }
 0x15c   :  { %5137 = vmatprep.subr.bf16.mxu0 %v5517_v1 }
 0x15f   :  { %5138 = vmatpush3.bf16.msra.mxu0 %v5518_v2 }
 0x160   :  { %5159 = vmatprep.subr.bf16.mxu0 %v5572_v31 }
 0x162   :  { %3868 = vmatmul.mubr.bf16.vlgmr.msra.gmra.mrb[40].mxu0 %v317_v3 }
 0x163   :  { %5163 = vmatprep.mubr.msk.bf16.mxu0 %vm5573_vm0, %v5572_v31 }
 0x175   :  { %v4875_v4 = vpop.f32.mrb[16].mxu0 }
 0x176   :  { %v4876_v5 = vpop.f32.mrb[17].mxu0 }
 0x177   :  { %v4877_v6 = vadd.f32 %v4876_v5, %v4875_v4  ;;  %v4878_v7 = vpop.f32.mrb[18].mxu0  ;;  %v4897_v8 = vpop.f32.mrb[16].mxu1 }
 0x178   :  { %v4879_v9 = vpop.f32.mrb[19].mxu0  ;;  %v4898_v10 = vpop.f32.mrb[17].mxu1 }
 0x179   :  { %v3390_v11 = vadd.f32 %v4877_v6, %v3350_v0  ;;  %v4899_v12 = vadd.f32 %v4898_v10, %v4897_v8  ;;  %v4900_v13 = vpop.f32.mrb[18].mxu1 }
 0x17a   :  { %v4901_v14 = vpop.f32.mrb[19].mxu1 }
 0x17b   :  { %v3430_v15 = vadd.f32 %v4899_v12, %v3390_v11 }
 0x195   :  { %v4919_v16 = vpop.f32.mrb[20].mxu0 }
 0x196   :  { %v4920_v17 = vpop.f32.mrb[21].mxu0 }
 0x197   :  { %v4921_v18 = vadd.f32 %v4920_v17, %v4919_v16  ;;  %v4922_v19 = vpop.f32.mrb[22].mxu0  ;;  %v4941_v20 = vpop.f32.mrb[20].mxu1 }
 0x198   :  { %v4923_v21 = vpop.f32.mrb[23].mxu0  ;;  %v4942_v22 = vpop.f32.mrb[21].mxu1 }
 0x199   :  { %v3470_v23 = vadd.f32 %v4921_v18, %v3430_v15  ;;  %v4943_v24 = vadd.f32 %v4942_v22, %v4941_v20  ;;  %v4944_v25 = vpop.f32.mrb[22].mxu1 }
 0x19a   :  { %v4945_v26 = vpop.f32.mrb[23].mxu1 }
 0x19b   :  { %v3510_v27 = vadd.f32 %v4943_v24, %v3470_v23 }
 0x1b5   :  { %v4963_v28 = vpop.f32.mrb[24].mxu0 }
 0x1b6   :  { %v4964_v30 = vpop.f32.mrb[25].mxu0 }
 0x1b7   :  { %v4965_v32 = vadd.f32 %v4964_v30, %v4963_v28  ;;  %v4966_v33 = vpop.f32.mrb[26].mxu0  ;;  %v4985_v35 = vpop.f32.mrb[24].mxu1  ;;  %v5524_v28 = vld [vmem:[%s6786_s4 + $0x18] ss:$28 sps:$4 sm:$0xff]  }
 0x1b8   :  { %v4967_v36 = vpop.f32.mrb[27].mxu0  ;;  %v4986_v37 = vpop.f32.mrb[25].mxu1  ;;  %5160 = vmatpush3.bf16.msra.mxu0 %v5524_v28  ;;  %v5527_v33 = vld [vmem:[%s6786_s4 + $0x3c] ss:$28 sps:$4 sm:$0xff]  }
 0x1b9   :  { %v3550_v38 = vadd.f32 %v4965_v32, %v3510_v27  ;;  %v4987_v39 = vadd.f32 %v4986_v37, %v4985_v35  ;;  %v4988_v40 = vpop.f32.mrb[26].mxu1  ;;  %5161 = vmatprep.subr.bf16.mxu0 %v5572_v31  ;;  %v5525_v35 = vld [vmem:[%s6786_s4 + $0x38] ss:$28 sps:$4 sm:$0xff]   ;;  %v5528_v36 = vld [vmem:[%s6786_s4 + $0x50] ss:$28 sps:$4 sm:$0xff]   ;;  %4058 = vmatprep.subr.bf16.mxu1 %v5527_v33 }
 0x1ba   :  { %v4989_v41 = vpop.f32.mrb[27].mxu1  ;;  %4059 = vmatpush1.bf16.msra.mxu1 %v5525_v35  ;;  %v5531_v37 = vld [vmem:[%s6786_s4 + $0xc] ss:$28 sps:$4 sm:$0xff]  }
 0x1bb   :  { %v3590_v42 = vadd.f32 %v4987_v39, %v3550_v38  ;;  %v5574_v38 = vmov 0   ;;  %4097 = vmatprep.subr.bf16.mxu1 %v5531_v37  ;;  %v3915_v39 = vld [vmem:[%s6788_s3] sm:$0x3] }
 0x1bc   :  { %5162 = vmatpush3.bf16.msra.mxu0 %v5528_v36  ;;  %4088 = vmatprep.mubr.bf16.mxu1 %v5574_v38 }
 0x1d5   :  { %v5007_v45 = vpop.f32.mrb[28].mxu0 }
 0x1d6   :  { %v5008_v46 = vpop.f32.mrb[29].mxu0 }
 0x1d7   :  { %v5009_v47 = vadd.f32 %v5008_v46, %v5007_v45  ;;  %v5010_v48 = vpop.f32.mrb[30].mxu0  ;;  %v5029_v49 = vpop.f32.mrb[28].mxu1  ;;  %v5534_v45 = vld [vmem:[%s6786_s4 + $0x44] ss:$28 sps:$4 sm:$0xff]  }
 0x1d8   :  { %v5011_v50 = vpop.f32.mrb[31].mxu0  ;;  %v5030_v51 = vpop.f32.mrb[29].mxu1  ;;  %v5532_v46 = vld [vmem:[%s6786_s4 + $0x40] ss:$28 sps:$4 sm:$0xff]   ;;  %v5535_v48 = vld [vmem:[%s6786_s4 + $0x10] ss:$28 sps:$4 sm:$0xff]  }
 0x1d9   :  { %v3630_v52 = vadd.f32 %v5009_v47, %v3590_v42  ;;  %v5031_v53 = vadd.f32 %v5030_v51, %v5029_v49  ;;  %v5032_v54 = vpop.f32.mrb[30].mxu1  ;;  %v5537_v47 = vld [vmem:[%s6786_s4 + $0x14] ss:$28 sps:$4 sm:$0xff]   ;;  %v5540_v49 = vld [vmem:[%s6786_s4 + $0x4c] ss:$28 sps:$4 sm:$0xff]   ;;  %v3948_v51 = vsub.s32 0, %v5691_v29 }
 0x1da   :  { %v5033_v55 = vpop.f32.mrb[31].mxu1  ;;  %v5538_v50 = vld [vmem:[%s6786_s4 + $0x48] ss:$28 sps:$4 sm:$0xff]  }
 0x1db   :  { %v3670_v56 = vadd.f32 %v5031_v53, %v3630_v52  ;;  %v3944_v52 = vld [vmem:[%s6789_s5] sm:$0x7f]  ;;  %v3952_v53 = vsub.s32 1, %v5691_v29 }
 0x1dc   :  { %v3949_v54 = vrot.slane %v3944_v52, %v3948_v51 }
 0x1dd   :  { %v3953_v55 = vrot.slane %v3944_v52, %v3952_v53 }
 0x1f5   :  { %v5051_v57 = vpop.f32.mrb[32].mxu0 }
 0x1f6   :  { %v5052_v58 = vpop.f32.mrb[33].mxu0 }
 0x1f7   :  { %v5053_v59 = vadd.f32 %v5052_v58, %v5051_v57  ;;  %v5054_v60 = vpop.f32.mrb[34].mxu0  ;;  %v5073_v61 = vpop.f32.mrb[32].mxu1  ;;  %v3972_v57 = vsub.s32 6, %v5691_v29 }
 0x1f8   :  { %v5055_v62 = vpop.f32.mrb[35].mxu0  ;;  %v5074_v63 = vpop.f32.mrb[33].mxu1 }
 0x1f9   :  { %v3710_v0 = vadd.f32 %v5053_v59, %v3670_v56  ;;  %v5075_v1 = vadd.f32 %v5074_v63, %v5073_v61  ;;  %v5076_v2 = vpop.f32.mrb[34].mxu1  ;;  %v3956_v62 = vsub.s32 2, %v5691_v29 }
 0x1fa   :  { %v5077_v3 = vpop.f32.mrb[35].mxu1  ;;  %v3960_v2 = vsub.s32 3, %v5691_v29 }
 0x1fb   :  { %v3750_v4 = vadd.f32 %v5075_v1, %v3710_v0 }
 0x215   :  { %v5095_v5 = vpop.f32.mrb[36].mxu0 }
 0x216   :  { %v5096_v6 = vpop.f32.mrb[37].mxu0 }
 0x217   :  { %v5097_v7 = vadd.f32 %v5096_v6, %v5095_v5  ;;  %v5098_v8 = vpop.f32.mrb[38].mxu0  ;;  %v5117_v9 = vpop.f32.mrb[36].mxu1  ;;  %v3973_v6 = vrot.slane %v3944_v52, %v3972_v57 }
 0x218   :  { %v5099_v10 = vpop.f32.mrb[39].mxu0  ;;  %v5118_v11 = vpop.f32.mrb[37].mxu1  ;;  %v3957_v8 = vrot.slane %v3944_v52, %v3956_v62 }
 0x219   :  { %v3790_v12 = vadd.f32 %v5097_v7, %v3750_v4  ;;  %v5119_v13 = vadd.f32 %v5118_v11, %v5117_v9  ;;  %v5120_v14 = vpop.f32.mrb[38].mxu1  ;;  %v3961_v9 = vrot.slane %v3944_v52, %v3960_v2 }
 0x21a   :  { %v5121_v15 = vpop.f32.mrb[39].mxu1  ;;  %v3964_v14 = vsub.s32 4, %v5691_v29 }
 0x21b   :  { %v3830_v16 = vadd.f32 %v5119_v13, %v3790_v12 }
 0x21f   :  { %v3909_v17 = vpop.f32.mrb[40].mxu1 }
 0x220   :  { %v5157_v18 = vpop.f32.mrb[41].mxu1 }
 0x221   :  { %v3912_v19 = vpop.f32.mrb[42].mxu1 }
 0x222   :  { %v5158_v20 = vpop.f32.mrb[43].mxu1 }
 0x235   :  { %v5139_v21 = vpop.f32.mrb[40].mxu0 }
 0x236   :  { %v5140_v22 = vpop.f32.mrb[41].mxu0 }
 0x237   :  { %v5141_v23 = vadd.f32 %v5140_v22, %v5139_v21  ;;  %v5142_v24 = vpop.f32.mrb[42].mxu0  ;;  %v3965_v22 = vrot.slane %v3944_v52, %v3964_v14 }
 0x238   :  { %v5143_v25 = vpop.f32.mrb[43].mxu0 }
 0x239   :  { %v3870_v26 = vadd.f32 %v5141_v23, %v3830_v16 }
 0x23b   :  { %v3910_v27 = vadd.f32 %v3909_v17, %v3870_v26  ;;  %v3968_v17 = vsub.s32 5, %v5691_v29 }
 0x23d   :  { %v3916_v30 = vmul.f32 0.5, %v3910_v27  ;;  %3926 = vst.msk [vmem:[%s6787_s7] sm:$0x3] %vm3925_vm2, %v3910_v27  ;;  %v3969_v23 = vrot.slane %v3944_v52, %v3968_v17 }
 0x23f   :  { %v3917_v32 = vmul.f32 1.442695, %v3916_v30 }
 0x241   :  { %5541 = vpow2.f32 %v3917_v32 }
 0x24b   :  { %v5542_v31 = vpop.eup %5541 }
 0x24c   :  { %3920 = vrot.lane.b32.xlu0 %v5542_v31, %s5575_s0 }
 0x2be   :  { %v3921_v40 = vpop.permute.xlu0 %3920 }
 0x2bf   :  { %v3923_v41 = vmul.f32 %v3921_v40, %v3915_v39 }
 0x2c1   :  { %v3924_v42 = vadd.f32 %v3923_v41, %v3910_v27 }
 0x2c3   :  { %v3927_v44 = vpack.c.bf16 %v3924_v42, %v3924_v42 }
 0x2c5   :  { %4672 = vmatmul.mubr.msk.bf16.vlgmr.msra.gmra.mrb[44].mxu1 %vm3031_vm1, %v3927_v44  ;;  %5164 = vmatmul.mubr.msk.bf16.vlgmr.msra.gmra.mrb[44].mxu0 %vm3031_vm1, %v3927_v44 }
 0x2c6   :  { %4098 = vmatpush1.bf16.msra.mxu1 %v5529_v43  ;;  %4129 = vmatprep.mubr.bf16.mxu1 %v5574_v38 }
 0x2c7   :  { %4099 = vmatprep.subr.bf16.mxu1 %v5534_v45 }
 0x2ca   :  { %4100 = vmatpush1.bf16.msra.mxu1 %v5532_v46 }
 0x2cb   :  { %4138 = vmatprep.subr.bf16.mxu1 %v5537_v47 }
 0x2cd   :  { %4673 = vmatmul.mubr.msk.bf16.vlgmr.msra.gmra.mrb[48].mxu1 %vm3031_vm1, %v3927_v44 }
 0x2ce   :  { %4139 = vmatpush1.bf16.msra.mxu1 %v5535_v48  ;;  %4170 = vmatprep.mubr.bf16.mxu1 %v5574_v38 }
 0x2cf   :  { %4140 = vmatprep.subr.bf16.mxu1 %v5540_v49 }
 0x2d2   :  { %4141 = vmatpush1.bf16.msra.mxu1 %v5538_v50 }
 0x2d5   :  { %4674 = vmatmul.mubr.msk.bf16.vlgmr.msra.gmra.mrb[52].mxu1 %vm3031_vm1, %v3927_v44 }
 0x398   :  { %v4090_v56 = vpop.f32.mrb[44].mxu1  ;;  %v4213_v58 = vpop.f32.mrb[44].mxu0 }
 0x399   :  { %v4091_v59 = vadd.f32 %v4090_v56, %v3949_v54  ;;  %v4092_v60 = vpop.f32.mrb[45].mxu1  ;;  %v5165_v61 = vpop.f32.mrb[45].mxu0  ;;  %v4214_v10 = vadd.f32 %v4213_v58, %v3973_v6 }
 0x39a   :  { %v4093_v63 = vadd.f32 %v4092_v60, %v3953_v55  ;;  %v4094_v0 = vpop.f32.mrb[46].mxu1  ;;  %v4216_v1 = vpop.f32.mrb[46].mxu0 }
 0x39b   :  { %v4676_v3 = vmul.f32 -1.442695, %v4091_v59  ;;  %v4095_v4 = vpop.f32.mrb[47].mxu1  ;;  %v5166_v5 = vpop.f32.mrb[47].mxu0  ;;  %v4682_v20 = vmul.f32 -1.442695, %v4214_v10 }
 0x39c   :  { %v4677_v7 = vmul.f32 -1.442695, %v4093_v63 }
 0x39d   :  { %5543 = vpow2.f32 %v4676_v3 }
 0x39e   :  { %5545 = vpow2.f32 %v4677_v7 }
 0x3a0   :  { %v4131_v11 = vpop.f32.mrb[48].mxu1 }
 0x3a1   :  { %v4132_v12 = vadd.f32 %v4131_v11, %v3957_v8  ;;  %v4133_v13 = vpop.f32.mrb[49].mxu1 }
 0x3a2   :  { %v4134_v15 = vadd.f32 %v4133_v13, %v3961_v9  ;;  %v4135_v16 = vpop.f32.mrb[50].mxu1 }
 0x3a3   :  { %v4678_v18 = vmul.f32 -1.442695, %v4132_v12  ;;  %v4136_v19 = vpop.f32.mrb[51].mxu1 }
 0x3a4   :  { %v4679_v21 = vmul.f32 -1.442695, %v4134_v15 }
 0x3a5   :  { %5547 = vpow2.f32 %v4678_v18 }
 0x3a6   :  { %5549 = vpow2.f32 %v4679_v21 }
 0x3a7   :  { %v5544_v24 = vpop.eup %5543  ;;  %5551 = vpow2.f32 %v4682_v20 }
 0x3a8   :  { %v4240_v25 = vadd.f32 1.0, %v5544_v24  ;;  %v4172_v26 = vpop.f32.mrb[52].mxu1  ;;  %v5546_v27 = vpop.eup %5545 }
 0x3a9   :  { %v4173_v28 = vadd.f32 %v4172_v26, %v3965_v22  ;;  %v4174_v30 = vpop.f32.mrb[53].mxu1  ;;  %v4241_v32 = vadd.f32 1.0, %v5546_v27 }
 0x3aa   :  { %5553 = vrcp.f32 %v4240_v25  ;;  %v4175_v33 = vadd.f32 %v4174_v30, %v3969_v23  ;;  %v4176_v35 = vpop.f32.mrb[54].mxu1 }
 0x3ab   :  { %v4680_v29 = vmul.f32 -1.442695, %v4173_v28  ;;  %v4177_v36 = vpop.f32.mrb[55].mxu1  ;;  %5555 = vrcp.f32 %v4241_v32 }
 0x3ac   :  { %v4681_v37 = vmul.f32 -1.442695, %v4175_v33 }
 0x3ad   :  { %5557 = vpow2.f32 %v4680_v29 }
 0x3ae   :  { %5559 = vpow2.f32 %v4681_v37 }
 0x3af   :  { %v5548_v38 = vpop.eup %5547 }
 0x3b0   :  { %v5550_v31 = vpop.eup %5549  ;;  %v4242_v39 = vadd.f32 1.0, %v5548_v38 }
 0x3b1   :  { %v4243_v40 = vadd.f32 1.0, %v5550_v31  ;;  %v5552_v41 = vpop.eup %5551 }
 0x3b2   :  { %5561 = vrcp.f32 %v4242_v39  ;;  %v4246_v43 = vadd.f32 1.0, %v5552_v41 }
 0x3b3   :  { %5563 = vrcp.f32 %v4243_v40 }
 0x3b4   :  { %v5554_v42 = vpop.eup %5553  ;;  %5565 = vrcp.f32 %v4246_v43 }
 0x3b5   :  { %v5556_v44 = vpop.eup %5555 }
 0x3b6   :  { %v4268_v46 = vcombine.low %v5554_v42, %v5556_v44 }
 0x3b7   :  { %v5558_v45 = vpop.eup %5557 }
 0x3b8   :  { %v5560_v47 = vpop.eup %5559  ;;  %v4244_v48 = vadd.f32 1.0, %v5558_v45  ;;  %v4276_v53 = vrot.slane %v4268_v46, %v5706_v34 }
 0x3b9   :  { %v4245_v49 = vadd.f32 1.0, %v5560_v47 }
 0x3ba   :  { %5567 = vrcp.f32 %v4244_v48 }
 0x3bb   :  { %5569 = vrcp.f32 %v4245_v49 }
 0x3bc   :  { %v5562_v50 = vpop.eup %5561 }
 0x3bd   :  { %v5564_v51 = vpop.eup %5563 }
 0x3be   :  { %v4269_v52 = vcombine.low %v5562_v50, %v5564_v51  ;;  %v5566_v56 = vpop.eup %5565 }
 0x3bf   :  { %v4299_v60 = vrot.slane %v5566_v56, %v5706_v34 }
 0x3c0   :  { %v4283_v54 = vrot.slane %v4269_v52, %v5706_v34 }
 0x3c2   :  { %v4284_v55 = vcombine.low %v4276_v53, %v4283_v54 }
 0x3c4   :  { %v5568_v57 = vpop.eup %5567  ;;  %4303 = vst [vmem:[%s6790_s6] sm:$0xff] %v4284_v55 }
 0x3c5   :  { %v5570_v58 = vpop.eup %5569 }
 0x3c6   :  { %v4285_v59 = vcombine.low %v5568_v57, %v5570_v58 }
 0x3c8   :  { %v4292_v61 = vrot.slane %v4285_v59, %v5706_v34 }
 0x3ca   :  { %v4300_v62 = vcombine.low %v4292_v61, %v4299_v60 }
 0x3cc   :  { %4309 = vst.msk [vmem:[%s6790_s6 + $0x8] sm:$0x3f] %vm4308_vm7, %v4300_v62 }

</bundles_post_ra>
